<compile_context>
chip_gen: v7x
topology: tpu7x:2x2x1
jax: 0.10.0
libtpu: 0.0.40
codegen_flags: <defaults>
</compile_context>

<pallas_src>
import functools

import jax
import jax.numpy as jnp
from jax.experimental import pallas as pl
from jax.experimental.pallas import tpu as pltpu


# ----------------------------------------------------------------------------
# Kernel: one grid step == bchunk batch elements x wchunk windows.
# ----------------------------------------------------------------------------
def _window_attn_kernel(x_ref, wqkv_ref, bqkv_ref, wp_ref, bp_ref,
                        rb_ref, mask_ref, o_ref, o_scr,
                        *, num_heads, head_dim, bchunk, wchunk, tokens):
    H, hd, N = num_heads, head_dim, tokens
    C = H * hd
    BW = bchunk * wchunk                    # windows handled this grid step
    M = BW * N                              # flattened rows this grid step

    # ---- fused QKV projection: one full-width MXU matmul (K=C, out=3C) ----
    x = x_ref[...].astype(jnp.bfloat16)                              # [M, C]
    qkv = jnp.dot(x, wqkv_ref[...],
                  preferred_element_type=jnp.float32) + bqkv_ref[...]  # [M, 3C]

    rb = rb_ref[...]                         # [H, N, N]       (rel-pos bias)
    msk = mask_ref[...]                      # [wchunk, N, N]  (shift mask)

    # ---- per-head attention (scores / softmax are inherently per-head) ----
    for h in range(H):                       # H is small (4-8): static unroll
        q = qkv[:, h * hd:(h + 1) * hd].reshape(BW, N, hd).astype(jnp.bfloat16)
        k = qkv[:, C + h * hd:C + (h + 1) * hd].reshape(BW, N, hd).astype(jnp.bfloat16)
        v = qkv[:, 2 * C + h * hd:2 * C + (h + 1) * hd].reshape(BW, N, hd).astype(jnp.bfloat16)

        # Scores (qk scale already folded into Wq/bq) + rel-pos bias + mask.
        s = jnp.einsum('bqd,bkd->bqk', q, k,
                       preferred_element_type=jnp.float32)           # [BW, N, N]
        s = (s.reshape(bchunk, wchunk, N, N)
             + rb[h][None, None] + msk[None]).reshape(BW, N, N)

        # Numerically-stable softmax; reciprocal goes to the EUP slot.
        m = jnp.max(s, axis=-1, keepdims=True)
        p = jnp.exp(s - m)
        attn = p * pl.reciprocal(jnp.sum(p, axis=-1, keepdims=True), approx=True)

        o_h = jnp.einsum('bqk,bkd->bqd', attn.astype(jnp.bfloat16), v,
                         preferred_element_type=jnp.float32)         # [BW, N, hd]

        # Head-concatenated layout lands in VMEM scratch -> one K=C proj matmul.
        o_scr[:, h * hd:(h + 1) * hd] = o_h.reshape(M, hd)

    # ---- fused output projection: one full-depth (K=C) MXU matmul ----
    out = jnp.dot(o_scr[...].astype(jnp.bfloat16), wp_ref[...],
                  preferred_element_type=jnp.float32) + bp_ref[...]
    o_ref[...] = out.astype(o_ref.dtype)


# ----------------------------------------------------------------------------
# Generation-aware VMEM budget and block selection.
# ----------------------------------------------------------------------------
def _vmem_limit_bytes():
    cap = None
    try:
        info = pltpu.get_tpu_info()
        for name in ("vmem_capacity_bytes", "vmem_size_bytes", "vmem_bytes"):
            v = getattr(info, name, None)
            if v:
                cap = int(v)
                break
    except Exception:
        cap = None
    if cap is None:
        cap = 64 * 1024 * 1024          # conservative (v7x-sized) default
    # Leave headroom for double buffers / compiler internal scratch.
    return min(cap * 3 // 4, 100 * 1024 * 1024)


def _largest_divisor_leq(n, cap):
    cap = max(1, min(n, cap))
    while n % cap:
        cap -= 1
    return cap


def _choose_block(batch, n_windows, tokens, target_rows):
    rows_per_batch = n_windows * tokens
    if rows_per_batch > target_rows:
        # Big images: one batch element per step, chunk the windows.
        bchunk = 1
        wchunk = _largest_divisor_leq(n_windows, max(1, target_rows // tokens))
    else:
        wchunk = n_windows
        bchunk = _largest_divisor_leq(batch, max(1, target_rows // rows_per_batch))
    # Prefer >= 2 grid steps so both v7x TensorCores get work.
    if (batch // bchunk) * (n_windows // wchunk) < 2:
        if batch > 1:
            bchunk = _largest_divisor_leq(batch, max(1, batch // 2))
        elif n_windows > 1:
            wchunk = _largest_divisor_leq(n_windows, max(1, n_windows // 2))
    return bchunk, wchunk


# ----------------------------------------------------------------------------
# Wrapper.
# ----------------------------------------------------------------------------
def window_attention(x, wqkv, bqkv, wproj, bproj, rel_bias, mask=None, *,
                     num_heads):
    """SwinIR WindowAttention forward.

    x:        [B_, N, C]   (B_ = batch * num_windows, batch-major)
    wqkv:     [C, 3C] (stored [in, out], columns ordered [3, H, hd]), bqkv: [3C]
    wproj:    [C, C],                                                 bproj: [C]
    rel_bias: [H, N, N]  relative position bias (table already gathered)
    mask:     [nW, N, N] shift mask (0 / -100) or None
    """
    B_, N, C = x.shape
    H = num_heads
    hd = C // H
    scale = hd ** (-0.5)

    if mask is None:
        nW = 1
        mask = jnp.zeros((1, N, N), dtype=jnp.float32)
    else:
        nW = mask.shape[0]
    if B_ % nW:
        raise ValueError("B_ must be a multiple of the number of windows")
    batch = B_ // nW
    if N % 8:
        # TODO(synk): pad N (e.g. 7x7=49 -> 56) with -100-masked keys so the
        # flattened [rows, C] blocks stay (8,128)-tile aligned.
        raise ValueError("tokens per window must be a multiple of 8")

    # ---- one-time parameter prep (cheap, outside the hot loop) ----
    # qk scale folded into the q columns of W_qkv / b_qkv; weights in bf16.
    wqkv_s = wqkv.at[:, :C].multiply(scale).astype(jnp.bfloat16)          # [C, 3C]
    bqkv_s = bqkv.at[:C].multiply(scale).reshape(1, 3 * C).astype(jnp.float32)
    wp = wproj.astype(jnp.bfloat16)                                       # [C, C]
    bp = bproj.reshape(1, C).astype(jnp.float32)
    rel_bias = rel_bias.astype(jnp.float32)                               # [H, N, N]
    mask = mask.astype(jnp.float32)                                       # [nW, N, N]

    # Lane/sublane-dense activation slab (cast to bf16 happens in-kernel).
    x2 = x.reshape(B_ * N, C)

    # ---- generation-aware block / grid selection ----
    vmem_limit = _vmem_limit_bytes()
    per_row_bytes = 32 * C + 8 * N + 64      # x/out tiles + qkv/o/score temporaries
    target_rows = max(256, min(4096, (vmem_limit // 2) // per_row_bytes))
    bchunk, wchunk = _choose_block(batch, nW, N, target_rows)
    rows_blk = bchunk * wchunk * N
    wsteps = nW // wchunk
    grid = (batch // bchunk, wsteps)

    kernel = functools.partial(_window_attn_kernel, num_heads=H, head_dim=hd,
                               bchunk=bchunk, wchunk=wchunk, tokens=N)

    out2 = pl.pallas_call(
        kernel,
        out_shape=jax.ShapeDtypeStruct((B_ * N, C), x.dtype),
        grid_spec=pltpu.PrefetchScalarGridSpec(
            num_scalar_prefetch=0,
            grid=grid,
            in_specs=[
                pl.BlockSpec((rows_blk, C), lambda i, j: (i * wsteps + j, 0)),  # x
                pl.BlockSpec((C, 3 * C), lambda i, j: (0, 0)),                  # Wqkv
                pl.BlockSpec((1, 3 * C), lambda i, j: (0, 0)),                  # bqkv
                pl.BlockSpec((C, C), lambda i, j: (0, 0)),                      # Wproj
                pl.BlockSpec((1, C), lambda i, j: (0, 0)),                      # bproj
                pl.BlockSpec((H, N, N), lambda i, j: (0, 0, 0)),                # rel_bias
                pl.BlockSpec((wchunk, N, N), lambda i, j: (j, 0, 0)),           # mask
            ],
            out_specs=pl.BlockSpec((rows_blk, C), lambda i, j: (i * wsteps + j, 0)),
            scratch_shapes=[pltpu.VMEM((rows_blk, C), jnp.float32)],
        ),
        compiler_params=pltpu.CompilerParams(
            dimension_semantics=("parallel", "parallel"),
            vmem_limit_bytes=vmem_limit,
        ),
    )(x2, wqkv_s, bqkv_s, wp, bp, rel_bias, mask)

    return out2.reshape(B_, N, C)


# ----------------------------------------------------------------------------
# Glue: relative-position index (same math as the PyTorch buffer) and a
# pure-JAX reference used to validate the kernel.
# ----------------------------------------------------------------------------
def make_relative_position_index(window_size):
    Wh, Ww = window_size
    coords = jnp.stack(jnp.meshgrid(jnp.arange(Wh), jnp.arange(Ww),
                                    indexing="ij"))                   # [2,Wh,Ww]
    coords_flatten = coords.reshape(2, -1)                            # [2,N]
    rel = coords_flatten[:, :, None] - coords_flatten[:, None, :]     # [2,N,N]
    rel = jnp.transpose(rel, (1, 2, 0))                               # [N,N,2]
    rel = rel.at[:, :, 0].add(Wh - 1)
    rel = rel.at[:, :, 1].add(Ww - 1)
    rel = rel.at[:, :, 0].multiply(2 * Ww - 1)
    return rel.sum(-1)                                                # [N,N]


def reference_window_attention(x, wqkv, bqkv, wproj, bproj, rel_bias, mask, *,
                               num_heads):
    """Pure-JAX (f32) mirror of the PyTorch forward."""
    B_, N, C = x.shape
    hd = C // num_heads
    scale = hd ** (-0.5)
    qkv = (x @ wqkv + bqkv).reshape(B_, N, 3, num_heads, hd)
    qkv = jnp.transpose(qkv, (2, 0, 3, 1, 4))
    q, k, v = qkv[0] * scale, qkv[1], qkv[2]
    attn = jnp.einsum("bhnd,bhmd->bhnm", q, k) + rel_bias[None]
    if mask is not None:
        nW = mask.shape[0]
        attn = attn.reshape(B_ // nW, nW, num_heads, N, N) + mask[None, :, None]
        attn = attn.reshape(B_, num_heads, N, N)
    attn = jax.nn.softmax(attn, axis=-1)
    out = jnp.einsum("bhnm,bhmd->bhnd", attn, v)
    out = jnp.transpose(out, (0, 2, 1, 3)).reshape(B_, N, C)
    return out @ wproj + bproj


if __name__ == "__main__":
    # Small, module-consistent shapes.
    dim = 32                  # C
    window_size = (4, 4)      # Wh, Ww -> N = 16
    num_heads = 4             # head_dim = 8
    batch = 2
    num_windows = 4
    B_ = batch * num_windows
    N = window_size[0] * window_size[1]

    key = jax.random.PRNGKey(0)
    k_x, k_tbl, k_wq, k_bq, k_wp, k_bp, k_m = jax.random.split(key, 7)

    x = jax.random.normal(k_x, (B_, N, dim), dtype=jnp.float32)

    # Deterministic parameter init (trunc_normal approximated by normal*0.02).
    rpb_table = 0.02 * jax.random.normal(
        k_tbl, ((2 * window_size[0] - 1) * (2 * window_size[1] - 1), num_heads),
        dtype=jnp.float32)
    wqkv = 0.05 * jax.random.normal(k_wq, (dim, 3 * dim), dtype=jnp.float32)
    bqkv = 0.05 * jax.random.normal(k_bq, (3 * dim,), dtype=jnp.float32)
    wproj = 0.05 * jax.random.normal(k_wp, (dim, dim), dtype=jnp.float32)
    bproj = 0.05 * jax.random.normal(k_bp, (dim,), dtype=jnp.float32)

    # Relative position bias [H, N, N] (one-time table gather, plain JAX).
    rel_idx = make_relative_position_index(window_size)               # [N,N]
    rel_bias = rpb_table[rel_idx.reshape(-1)].reshape(N, N, num_heads)
    rel_bias = jnp.transpose(rel_bias, (2, 0, 1))                     # [H,N,N]

    # Shifted-window mask (0 / -100 pattern), shape [num_windows, N, N].
    mask = jnp.where(jax.random.bernoulli(k_m, 0.3, (num_windows, N, N)),
                     jnp.float32(-100.0), jnp.float32(0.0))

    out = window_attention(x, wqkv, bqkv, wproj, bproj, rel_bias, mask,
                           num_heads=num_heads)
    out = jax.block_until_ready(out)

    ref = reference_window_attention(x, wqkv, bqkv, wproj, bproj, rel_bias,
                                     mask, num_heads=num_heads)
    err = float(jnp.max(jnp.abs(out - ref)))
    # bf16 matmuls with f32 accumulation vs an f32 reference.
    assert jnp.allclose(out, ref, atol=2e-2, rtol=2e-2), f"max abs err {err}"

    print("KERNEL_OK")
</pallas_src>

<mosaic_0001>
module attributes {stable_mosaic.version = 11 : i64} {
  func.func @_window_attn_kernel(%arg0: i32, %arg1: i32, %arg2: memref<64x32xf32, #tpu.memory_space<vmem>>, %arg3: memref<32x96xbf16, #tpu.memory_space<vmem>>, %arg4: memref<1x96xf32, #tpu.memory_space<vmem>>, %arg5: memref<32x32xbf16, #tpu.memory_space<vmem>>, %arg6: memref<1x32xf32, #tpu.memory_space<vmem>>, %arg7: memref<4x16x16xf32, #tpu.memory_space<vmem>>, %arg8: memref<4x16x16xf32, #tpu.memory_space<vmem>>, %arg9: memref<64x32xf32, #tpu.memory_space<vmem>>, %arg10: memref<64x32xf32, #tpu.memory_space<vmem>>) attributes {dimension_semantics = [#tpu.dimension_semantics<parallel>, #tpu.dimension_semantics<parallel>], iteration_bounds = array<i64: 2, 1>, scalar_prefetch = 0 : i64, scratch_operands = 1 : i64, tpu.core_type = #tpu.core_type<tc>, window_params = [{transform_indices = @transform_0, window_bounds = array<i64: 64, 32>}, {pipeline_mode = #tpu.pipeline_mode<synchronous>, transform_indices = @transform_1, window_bounds = array<i64: 32, 96>}, {pipeline_mode = #tpu.pipeline_mode<synchronous>, transform_indices = @transform_2, window_bounds = array<i64: 1, 96>}, {pipeline_mode = #tpu.pipeline_mode<synchronous>, transform_indices = @transform_3, window_bounds = array<i64: 32, 32>}, {pipeline_mode = #tpu.pipeline_mode<synchronous>, transform_indices = @transform_4, window_bounds = array<i64: 1, 32>}, {pipeline_mode = #tpu.pipeline_mode<synchronous>, transform_indices = @transform_5, window_bounds = array<i64: 4, 16, 16>}, {transform_indices = @transform_6, window_bounds = array<i64: 4, 16, 16>}, {transform_indices = @transform_7, window_bounds = array<i64: 64, 32>}]} {
    %c0 = arith.constant 0 : index
    %c0_0 = arith.constant 0 : index
    %0 = vector.load %arg2[%c0, %c0_0] : memref<64x32xf32, #tpu.memory_space<vmem>>, vector<64x32xf32>
    %1 = arith.truncf %0 : vector<64x32xf32> to vector<64x32xbf16>
    %c0_1 = arith.constant 0 : index
    %c0_2 = arith.constant 0 : index
    %2 = vector.load %arg3[%c0_1, %c0_2] : memref<32x96xbf16, #tpu.memory_space<vmem>>, vector<32x96xbf16>
    %cst = arith.constant dense<0.000000e+00> : vector<64x96xf32>
    %3 = tpu.matmul %1, %2, %cst {dimension_numbers = #tpu.dot_dimension_numbers<[1], [0], [0], [1], [0, 0, 1, 1], [], []>} : vector<64x32xbf16>, vector<32x96xbf16>, vector<64x96xf32> -> vector<64x96xf32>
    %c0_3 = arith.constant 0 : index
    %c0_4 = arith.constant 0 : index
    %4 = vector.load %arg4[%c0_3, %c0_4] : memref<1x96xf32, #tpu.memory_space<vmem>>, vector<1x96xf32>
    %5 = vector.broadcast %4 : vector<1x96xf32> to vector<64x96xf32>
    %6 = arith.addf %3, %5 : vector<64x96xf32>
    %c0_5 = arith.constant 0 : index
    %c0_6 = arith.constant 0 : index
    %c0_7 = arith.constant 0 : index
    %7 = vector.load %arg7[%c0_5, %c0_6, %c0_7] : memref<4x16x16xf32, #tpu.memory_space<vmem>>, vector<4x16x16xf32>
    %c0_8 = arith.constant 0 : index
    %c0_9 = arith.constant 0 : index
    %c0_10 = arith.constant 0 : index
    %8 = vector.load %arg8[%c0_8, %c0_9, %c0_10] : memref<4x16x16xf32, #tpu.memory_space<vmem>>, vector<4x16x16xf32>
    %9 = vector.extract_strided_slice %6 {offsets = [0, 0], sizes = [64, 8], strides = [1, 1]} : vector<64x96xf32> to vector<64x8xf32>
    %10 = vector.shape_cast %9 : vector<64x8xf32> to vector<4x16x8xf32>
    %11 = arith.truncf %10 : vector<4x16x8xf32> to vector<4x16x8xbf16>
    %12 = vector.extract_strided_slice %6 {offsets = [0, 32], sizes = [64, 8], strides = [1, 1]} : vector<64x96xf32> to vector<64x8xf32>
    %13 = vector.shape_cast %12 : vector<64x8xf32> to vector<4x16x8xf32>
    %14 = arith.truncf %13 : vector<4x16x8xf32> to vector<4x16x8xbf16>
    %15 = vector.extract_strided_slice %6 {offsets = [0, 64], sizes = [64, 8], strides = [1, 1]} : vector<64x96xf32> to vector<64x8xf32>
    %16 = vector.shape_cast %15 : vector<64x8xf32> to vector<4x16x8xf32>
    %17 = arith.truncf %16 : vector<4x16x8xf32> to vector<4x16x8xbf16>
    "tpu.trace_start"() <{level = 10 : i32, message = "bqd,bkd->bqk"}> : () -> ()
    %cst_11 = arith.constant dense<0.000000e+00> : vector<4x16x16xf32>
    %18 = tpu.matmul %11, %14, %cst_11 {dimension_numbers = #tpu.dot_dimension_numbers<[2], [2], [1], [1], [0, 0, 0, 1, 1, 1], [0], [0]>} : vector<4x16x8xbf16>, vector<4x16x8xbf16>, vector<4x16x16xf32> -> vector<4x16x16xf32>
    "tpu.trace_stop"() : () -> ()
    %19 = vector.shape_cast %18 : vector<4x16x16xf32> to vector<1x4x16x16xf32>
    %20 = vector.extract_strided_slice %7 {offsets = [0, 0, 0], sizes = [1, 16, 16], strides = [1, 1, 1]} : vector<4x16x16xf32> to vector<1x16x16xf32>
    %21 = vector.shape_cast %20 : vector<1x16x16xf32> to vector<16x16xf32>
    %22 = vector.shape_cast %21 : vector<16x16xf32> to vector<1x1x16x16xf32>
    %23 = vector.broadcast %22 : vector<1x1x16x16xf32> to vector<1x4x16x16xf32>
    %24 = arith.addf %19, %23 : vector<1x4x16x16xf32>
    %25 = vector.shape_cast %8 : vector<4x16x16xf32> to vector<1x4x16x16xf32>
    %26 = arith.addf %24, %25 : vector<1x4x16x16xf32>
    %27 = vector.shape_cast %26 : vector<1x4x16x16xf32> to vector<4x16x16xf32>
    %cst_12 = arith.constant dense<0xFF800000> : vector<4x16xf32>
    %28 = vector.multi_reduction <maximumf>, %27, %cst_12 [2] : vector<4x16x16xf32> to vector<4x16xf32>
    %29 = vector.shape_cast %28 : vector<4x16xf32> to vector<4x16x1xf32>
    %30 = vector.broadcast %29 : vector<4x16x1xf32> to vector<4x16x16xf32>
    %31 = arith.subf %27, %30 : vector<4x16x16xf32>
    %32 = math.exp %31 : vector<4x16x16xf32>
    %cst_13 = arith.constant dense<0.000000e+00> : vector<4x16xf32>
    %33 = vector.multi_reduction <add>, %32, %cst_13 [2] : vector<4x16x16xf32> to vector<4x16xf32>
    %34 = vector.shape_cast %33 : vector<4x16xf32> to vector<4x16x1xf32>
    %35 = tpu.reciprocal %34 {approx = true} : vector<4x16x1xf32> -> vector<4x16x1xf32>
    %36 = vector.broadcast %35 : vector<4x16x1xf32> to vector<4x16x16xf32>
    %37 = arith.mulf %32, %36 : vector<4x16x16xf32>
    %38 = arith.truncf %37 : vector<4x16x16xf32> to vector<4x16x16xbf16>
    "tpu.trace_start"() <{level = 10 : i32, message = "bqk,bkd->bqd"}> : () -> ()
    %cst_14 = arith.constant dense<0.000000e+00> : vector<4x16x8xf32>
    %39 = tpu.matmul %38, %17, %cst_14 {dimension_numbers = #tpu.dot_dimension_numbers<[2], [1], [1], [2], [0, 0, 0, 1, 1, 2], [0], [0]>} : vector<4x16x16xbf16>, vector<4x16x8xbf16>, vector<4x16x8xf32> -> vector<4x16x8xf32>
    "tpu.trace_stop"() : () -> ()
    %40 = vector.shape_cast %39 : vector<4x16x8xf32> to vector<64x8xf32>
    %c0_15 = arith.constant 0 : index
    %c0_16 = arith.constant 0 : index
    %41 = vector.load %arg10[%c0_15, %c0_16] : memref<64x32xf32, #tpu.memory_space<vmem>>, vector<64x8xf32>
    tpu.vector_store %arg10[%c0_15, %c0_16], %40 {strides = array<i32>} : memref<64x32xf32, #tpu.memory_space<vmem>>, vector<64x8xf32>,
    %42 = vector.extract_strided_slice %6 {offsets = [0, 8], sizes = [64, 8], strides = [1, 1]} : vector<64x96xf32> to vector<64x8xf32>
    %43 = vector.shape_cast %42 : vector<64x8xf32> to vector<4x16x8xf32>
    %44 = arith.truncf %43 : vector<4x16x8xf32> to vector<4x16x8xbf16>
    %45 = vector.extract_strided_slice %6 {offsets = [0, 40], sizes = [64, 8], strides = [1, 1]} : vector<64x96xf32> to vector<64x8xf32>
    %46 = vector.shape_cast %45 : vector<64x8xf32> to vector<4x16x8xf32>
    %47 = arith.truncf %46 : vector<4x16x8xf32> to vector<4x16x8xbf16>
    %48 = vector.extract_strided_slice %6 {offsets = [0, 72], sizes = [64, 8], strides = [1, 1]} : vector<64x96xf32> to vector<64x8xf32>
    %49 = vector.shape_cast %48 : vector<64x8xf32> to vector<4x16x8xf32>
    %50 = arith.truncf %49 : vector<4x16x8xf32> to vector<4x16x8xbf16>
    "tpu.trace_start"() <{level = 10 : i32, message = "bqd,bkd->bqk"}> : () -> ()
    %cst_17 = arith.constant dense<0.000000e+00> : vector<4x16x16xf32>
    %51 = tpu.matmul %44, %47, %cst_17 {dimension_numbers = #tpu.dot_dimension_numbers<[2], [2], [1], [1], [0, 0, 0, 1, 1, 1], [0], [0]>} : vector<4x16x8xbf16>, vector<4x16x8xbf16>, vector<4x16x16xf32> -> vector<4x16x16xf32>
    "tpu.trace_stop"() : () -> ()
    %52 = vector.shape_cast %51 : vector<4x16x16xf32> to vector<1x4x16x16xf32>
    %53 = vector.extract_strided_slice %7 {offsets = [1, 0, 0], sizes = [1, 16, 16], strides = [1, 1, 1]} : vector<4x16x16xf32> to vector<1x16x16xf32>
    %54 = vector.shape_cast %53 : vector<1x16x16xf32> to vector<16x16xf32>
    %55 = vector.shape_cast %54 : vector<16x16xf32> to vector<1x1x16x16xf32>
    %56 = vector.broadcast %55 : vector<1x1x16x16xf32> to vector<1x4x16x16xf32>
    %57 = arith.addf %52, %56 : vector<1x4x16x16xf32>
    %58 = vector.shape_cast %8 : vector<4x16x16xf32> to vector<1x4x16x16xf32>
    %59 = arith.addf %57, %58 : vector<1x4x16x16xf32>
    %60 = vector.shape_cast %59 : vector<1x4x16x16xf32> to vector<4x16x16xf32>
    %cst_18 = arith.constant dense<0xFF800000> : vector<4x16xf32>
    %61 = vector.multi_reduction <maximumf>, %60, %cst_18 [2] : vector<4x16x16xf32> to vector<4x16xf32>
    %62 = vector.shape_cast %61 : vector<4x16xf32> to vector<4x16x1xf32>
    %63 = vector.broadcast %62 : vector<4x16x1xf32> to vector<4x16x16xf32>
    %64 = arith.subf %60, %63 : vector<4x16x16xf32>
    %65 = math.exp %64 : vector<4x16x16xf32>
    %cst_19 = arith.constant dense<0.000000e+00> : vector<4x16xf32>
    %66 = vector.multi_reduction <add>, %65, %cst_19 [2] : vector<4x16x16xf32> to vector<4x16xf32>
    %67 = vector.shape_cast %66 : vector<4x16xf32> to vector<4x16x1xf32>
    %68 = tpu.reciprocal %67 {approx = true} : vector<4x16x1xf32> -> vector<4x16x1xf32>
    %69 = vector.broadcast %68 : vector<4x16x1xf32> to vector<4x16x16xf32>
    %70 = arith.mulf %65, %69 : vector<4x16x16xf32>
    %71 = arith.truncf %70 : vector<4x16x16xf32> to vector<4x16x16xbf16>
    "tpu.trace_start"() <{level = 10 : i32, message = "bqk,bkd->bqd"}> : () -> ()
    %cst_20 = arith.constant dense<0.000000e+00> : vector<4x16x8xf32>
    %72 = tpu.matmul %71, %50, %cst_20 {dimension_numbers = #tpu.dot_dimension_numbers<[2], [1], [1], [2], [0, 0, 0, 1, 1, 2], [0], [0]>} : vector<4x16x16xbf16>, vector<4x16x8xbf16>, vector<4x16x8xf32> -> vector<4x16x8xf32>
    "tpu.trace_stop"() : () -> ()
    %73 = vector.shape_cast %72 : vector<4x16x8xf32> to vector<64x8xf32>
    %c0_21 = arith.constant 0 : index
    %c8 = arith.constant 8 : index
    %74 = vector.load %arg10[%c0_21, %c8] : memref<64x32xf32, #tpu.memory_space<vmem>>, vector<64x8xf32>
    tpu.vector_store %arg10[%c0_21, %c8], %73 {strides = array<i32>} : memref<64x32xf32, #tpu.memory_space<vmem>>, vector<64x8xf32>,
    %75 = vector.extract_strided_slice %6 {offsets = [0, 16], sizes = [64, 8], strides = [1, 1]} : vector<64x96xf32> to vector<64x8xf32>
    %76 = vector.shape_cast %75 : vector<64x8xf32> to vector<4x16x8xf32>
    %77 = arith.truncf %76 : vector<4x16x8xf32> to vector<4x16x8xbf16>
    %78 = vector.extract_strided_slice %6 {offsets = [0, 48], sizes = [64, 8], strides = [1, 1]} : vector<64x96xf32> to vector<64x8xf32>
    %79 = vector.shape_cast %78 : vector<64x8xf32> to vector<4x16x8xf32>
    %80 = arith.truncf %79 : vector<4x16x8xf32> to vector<4x16x8xbf16>
    %81 = vector.extract_strided_slice %6 {offsets = [0, 80], sizes = [64, 8], strides = [1, 1]} : vector<64x96xf32> to vector<64x8xf32>
    %82 = vector.shape_cast %81 : vector<64x8xf32> to vector<4x16x8xf32>
    %83 = arith.truncf %82 : vector<4x16x8xf32> to vector<4x16x8xbf16>
    "tpu.trace_start"() <{level = 10 : i32, message = "bqd,bkd->bqk"}> : () -> ()
    %cst_22 = arith.constant dense<0.000000e+00> : vector<4x16x16xf32>
    %84 = tpu.matmul %77, %80, %cst_22 {dimension_numbers = #tpu.dot_dimension_numbers<[2], [2], [1], [1], [0, 0, 0, 1, 1, 1], [0], [0]>} : vector<4x16x8xbf16>, vector<4x16x8xbf16>, vector<4x16x16xf32> -> vector<4x16x16xf32>
    "tpu.trace_stop"() : () -> ()
    %85 = vector.shape_cast %84 : vector<4x16x16xf32> to vector<1x4x16x16xf32>
    %86 = vector.extract_strided_slice %7 {offsets = [2, 0, 0], sizes = [1, 16, 16], strides = [1, 1, 1]} : vector<4x16x16xf32> to vector<1x16x16xf32>
    %87 = vector.shape_cast %86 : vector<1x16x16xf32> to vector<16x16xf32>
    %88 = vector.shape_cast %87 : vector<16x16xf32> to vector<1x1x16x16xf32>
    %89 = vector.broadcast %88 : vector<1x1x16x16xf32> to vector<1x4x16x16xf32>
    %90 = arith.addf %85, %89 : vector<1x4x16x16xf32>
    %91 = vector.shape_cast %8 : vector<4x16x16xf32> to vector<1x4x16x16xf32>
    %92 = arith.addf %90, %91 : vector<1x4x16x16xf32>
    %93 = vector.shape_cast %92 : vector<1x4x16x16xf32> to vector<4x16x16xf32>
    %cst_23 = arith.constant dense<0xFF800000> : vector<4x16xf32>
    %94 = vector.multi_reduction <maximumf>, %93, %cst_23 [2] : vector<4x16x16xf32> to vector<4x16xf32>
    %95 = vector.shape_cast %94 : vector<4x16xf32> to vector<4x16x1xf32>
    %96 = vector.broadcast %95 : vector<4x16x1xf32> to vector<4x16x16xf32>
    %97 = arith.subf %93, %96 : vector<4x16x16xf32>
    %98 = math.exp %97 : vector<4x16x16xf32>
    %cst_24 = arith.constant dense<0.000000e+00> : vector<4x16xf32>
    %99 = vector.multi_reduction <add>, %98, %cst_24 [2] : vector<4x16x16xf32> to vector<4x16xf32>
    %100 = vector.shape_cast %99 : vector<4x16xf32> to vector<4x16x1xf32>
    %101 = tpu.reciprocal %100 {approx = true} : vector<4x16x1xf32> -> vector<4x16x1xf32>
    %102 = vector.broadcast %101 : vector<4x16x1xf32> to vector<4x16x16xf32>
    %103 = arith.mulf %98, %102 : vector<4x16x16xf32>
    %104 = arith.truncf %103 : vector<4x16x16xf32> to vector<4x16x16xbf16>
    "tpu.trace_start"() <{level = 10 : i32, message = "bqk,bkd->bqd"}> : () -> ()
    %cst_25 = arith.constant dense<0.000000e+00> : vector<4x16x8xf32>
    %105 = tpu.matmul %104, %83, %cst_25 {dimension_numbers = #tpu.dot_dimension_numbers<[2], [1], [1], [2], [0, 0, 0, 1, 1, 2], [0], [0]>} : vector<4x16x16xbf16>, vector<4x16x8xbf16>, vector<4x16x8xf32> -> vector<4x16x8xf32>
    "tpu.trace_stop"() : () -> ()
    %106 = vector.shape_cast %105 : vector<4x16x8xf32> to vector<64x8xf32>
    %c0_26 = arith.constant 0 : index
    %c16 = arith.constant 16 : index
    %107 = vector.load %arg10[%c0_26, %c16] : memref<64x32xf32, #tpu.memory_space<vmem>>, vector<64x8xf32>
    tpu.vector_store %arg10[%c0_26, %c16], %106 {strides = array<i32>} : memref<64x32xf32, #tpu.memory_space<vmem>>, vector<64x8xf32>,
    %108 = vector.extract_strided_slice %6 {offsets = [0, 24], sizes = [64, 8], strides = [1, 1]} : vector<64x96xf32> to vector<64x8xf32>
    %109 = vector.shape_cast %108 : vector<64x8xf32> to vector<4x16x8xf32>
    %110 = arith.truncf %109 : vector<4x16x8xf32> to vector<4x16x8xbf16>
    %111 = vector.extract_strided_slice %6 {offsets = [0, 56], sizes = [64, 8], strides = [1, 1]} : vector<64x96xf32> to vector<64x8xf32>
    %112 = vector.shape_cast %111 : vector<64x8xf32> to vector<4x16x8xf32>
    %113 = arith.truncf %112 : vector<4x16x8xf32> to vector<4x16x8xbf16>
    %114 = vector.extract_strided_slice %6 {offsets = [0, 88], sizes = [64, 8], strides = [1, 1]} : vector<64x96xf32> to vector<64x8xf32>
    %115 = vector.shape_cast %114 : vector<64x8xf32> to vector<4x16x8xf32>
    %116 = arith.truncf %115 : vector<4x16x8xf32> to vector<4x16x8xbf16>
    "tpu.trace_start"() <{level = 10 : i32, message = "bqd,bkd->bqk"}> : () -> ()
    %cst_27 = arith.constant dense<0.000000e+00> : vector<4x16x16xf32>
    %117 = tpu.matmul %110, %113, %cst_27 {dimension_numbers = #tpu.dot_dimension_numbers<[2], [2], [1], [1], [0, 0, 0, 1, 1, 1], [0], [0]>} : vector<4x16x8xbf16>, vector<4x16x8xbf16>, vector<4x16x16xf32> -> vector<4x16x16xf32>
    "tpu.trace_stop"() : () -> ()
    %118 = vector.shape_cast %117 : vector<4x16x16xf32> to vector<1x4x16x16xf32>
    %119 = vector.extract_strided_slice %7 {offsets = [3, 0, 0], sizes = [1, 16, 16], strides = [1, 1, 1]} : vector<4x16x16xf32> to vector<1x16x16xf32>
    %120 = vector.shape_cast %119 : vector<1x16x16xf32> to vector<16x16xf32>
    %121 = vector.shape_cast %120 : vector<16x16xf32> to vector<1x1x16x16xf32>
    %122 = vector.broadcast %121 : vector<1x1x16x16xf32> to vector<1x4x16x16xf32>
    %123 = arith.addf %118, %122 : vector<1x4x16x16xf32>
    %124 = vector.shape_cast %8 : vector<4x16x16xf32> to vector<1x4x16x16xf32>
    %125 = arith.addf %123, %124 : vector<1x4x16x16xf32>
    %126 = vector.shape_cast %125 : vector<1x4x16x16xf32> to vector<4x16x16xf32>
    %cst_28 = arith.constant dense<0xFF800000> : vector<4x16xf32>
    %127 = vector.multi_reduction <maximumf>, %126, %cst_28 [2] : vector<4x16x16xf32> to vector<4x16xf32>
    %128 = vector.shape_cast %127 : vector<4x16xf32> to vector<4x16x1xf32>
    %129 = vector.broadcast %128 : vector<4x16x1xf32> to vector<4x16x16xf32>
    %130 = arith.subf %126, %129 : vector<4x16x16xf32>
    %131 = math.exp %130 : vector<4x16x16xf32>
    %cst_29 = arith.constant dense<0.000000e+00> : vector<4x16xf32>
    %132 = vector.multi_reduction <add>, %131, %cst_29 [2] : vector<4x16x16xf32> to vector<4x16xf32>
    %133 = vector.shape_cast %132 : vector<4x16xf32> to vector<4x16x1xf32>
    %134 = tpu.reciprocal %133 {approx = true} : vector<4x16x1xf32> -> vector<4x16x1xf32>
    %135 = vector.broadcast %134 : vector<4x16x1xf32> to vector<4x16x16xf32>
    %136 = arith.mulf %131, %135 : vector<4x16x16xf32>
    %137 = arith.truncf %136 : vector<4x16x16xf32> to vector<4x16x16xbf16>
    "tpu.trace_start"() <{level = 10 : i32, message = "bqk,bkd->bqd"}> : () -> ()
    %cst_30 = arith.constant dense<0.000000e+00> : vector<4x16x8xf32>
    %138 = tpu.matmul %137, %116, %cst_30 {dimension_numbers = #tpu.dot_dimension_numbers<[2], [1], [1], [2], [0, 0, 0, 1, 1, 2], [0], [0]>} : vector<4x16x16xbf16>, vector<4x16x8xbf16>, vector<4x16x8xf32> -> vector<4x16x8xf32>
    "tpu.trace_stop"() : () -> ()
    %139 = vector.shape_cast %138 : vector<4x16x8xf32> to vector<64x8xf32>
    %c0_31 = arith.constant 0 : index
    %c24 = arith.constant 24 : index
    %140 = vector.load %arg10[%c0_31, %c24] : memref<64x32xf32, #tpu.memory_space<vmem>>, vector<64x8xf32>
    tpu.vector_store %arg10[%c0_31, %c24], %139 {strides = array<i32>} : memref<64x32xf32, #tpu.memory_space<vmem>>, vector<64x8xf32>,
    %c0_32 = arith.constant 0 : index
    %c0_33 = arith.constant 0 : index
    %141 = vector.load %arg10[%c0_32, %c0_33] : memref<64x32xf32, #tpu.memory_space<vmem>>, vector<64x32xf32>
    %142 = arith.truncf %141 : vector<64x32xf32> to vector<64x32xbf16>
    %c0_34 = arith.constant 0 : index
    %c0_35 = arith.constant 0 : index
    %143 = vector.load %arg5[%c0_34, %c0_35] : memref<32x32xbf16, #tpu.memory_space<vmem>>, vector<32x32xbf16>
    %cst_36 = arith.constant dense<0.000000e+00> : vector<64x32xf32>
    %144 = tpu.matmul %142, %143, %cst_36 {dimension_numbers = #tpu.dot_dimension_numbers<[1], [0], [0], [1], [0, 0, 1, 1], [], []>} : vector<64x32xbf16>, vector<32x32xbf16>, vector<64x32xf32> -> vector<64x32xf32>
    %c0_37 = arith.constant 0 : index
    %c0_38 = arith.constant 0 : index
    %145 = vector.load %arg6[%c0_37, %c0_38] : memref<1x32xf32, #tpu.memory_space<vmem>>, vector<1x32xf32>
    %146 = vector.broadcast %145 : vector<1x32xf32> to vector<64x32xf32>
    %147 = arith.addf %144, %146 : vector<64x32xf32>
    %c0_39 = arith.constant 0 : index
    %c0_40 = arith.constant 0 : index
    %148 = vector.load %arg9[%c0_39, %c0_40] : memref<64x32xf32, #tpu.memory_space<vmem>>, vector<64x32xf32>
    tpu.vector_store %arg9[%c0_39, %c0_40], %147 {strides = array<i32>} : memref<64x32xf32, #tpu.memory_space<vmem>>, vector<64x32xf32>,
    return
  }
  func.func @transform_0(%arg0: i32, %arg1: i32) -> (i32, i32) {
    %c1_i32 = arith.constant 1 : i32
    %0 = arith.muli %arg0, %c1_i32 : i32
    %1 = arith.addi %0, %arg1 : i32
    %c0_i32 = arith.constant 0 : i32
    %c0_i32_0 = arith.constant 0 : i32
    return %1, %c0_i32 : i32, i32
  }
  func.func @transform_1(%arg0: i32, %arg1: i32) -> (i32, i32) {
    %c0_i32 = arith.constant 0 : i32
    %c0_i32_0 = arith.constant 0 : i32
    %c0_i32_1 = arith.constant 0 : i32
    return %c0_i32, %c0_i32_0 : i32, i32
  }
  func.func @transform_2(%arg0: i32, %arg1: i32) -> (i32, i32) {
    %c0_i32 = arith.constant 0 : i32
    %c0_i32_0 = arith.constant 0 : i32
    %c0_i32_1 = arith.constant 0 : i32
    return %c0_i32, %c0_i32_0 : i32, i32
  }
  func.func @transform_3(%arg0: i32, %arg1: i32) -> (i32, i32) {
    %c0_i32 = arith.constant 0 : i32
    %c0_i32_0 = arith.constant 0 : i32
    %c0_i32_1 = arith.constant 0 : i32
    return %c0_i32, %c0_i32_0 : i32, i32
  }
  func.func @transform_4(%arg0: i32, %arg1: i32) -> (i32, i32) {
    %c0_i32 = arith.constant 0 : i32
    %c0_i32_0 = arith.constant 0 : i32
    %c0_i32_1 = arith.constant 0 : i32
    return %c0_i32, %c0_i32_0 : i32, i32
  }
  func.func @transform_5(%arg0: i32, %arg1: i32) -> (i32, i32, i32) {
    %c0_i32 = arith.constant 0 : i32
    %c0_i32_0 = arith.constant 0 : i32
    %c0_i32_1 = arith.constant 0 : i32
    %c0_i32_2 = arith.constant 0 : i32
    return %c0_i32, %c0_i32_0, %c0_i32_1 : i32, i32, i32
  }
  func.func @transform_6(%arg0: i32, %arg1: i32) -> (i32, i32, i32) {
    %c0_i32 = arith.constant 0 : i32
    %c0_i32_0 = arith.constant 0 : i32
    %c0_i32_1 = arith.constant 0 : i32
    return %arg1, %c0_i32, %c0_i32_0 : i32, i32, i32
  }
  func.func @transform_7(%arg0: i32, %arg1: i32) -> (i32, i32) {
    %c1_i32 = arith.constant 1 : i32
    %0 = arith.muli %arg0, %c1_i32 : i32
    %1 = arith.addi %0, %arg1 : i32
    %c0_i32 = arith.constant 0 : i32
    %c0_i32_0 = arith.constant 0 : i32
    return %1, %c0_i32 : i32, i32
  }
}

</mosaic_0001>

<bundles_post_ra>
// kernel: tpu_custom_call.1
= control target key start
LH: loop header
LB: loop body
LE: loop exit
PB: predicated region body
PF: predicated region fallthrough
CT: control target
= control target key end

     0   :  { %s3411_s24 = smov 0   ;;  %s3413_s25 = smov 0   ;;  %s4025_s0 = inlined_call_operand.vmem [shape: f32[128,32], index: 0, kind: input, shape index: {}]   ;;  %s4026_s1 = inlined_call_operand.vmem [shape: bf16[32,96], index: 1, kind: input, shape index: {}]   ;;  %s4027_s2 = inlined_call_operand.vmem [shape: f32[1,96], index: 2, kind: input, shape index: {}]   ;;  %s4028_s3 = inlined_call_operand.vmem [shape: bf16[32,32], index: 3, kind: input, shape index: {}]   ;;  %s4029_s4 = inlined_call_operand.vmem [shape: f32[1,32], index: 4, kind: input, shape index: {}]   ;;  %s4030_s5 = inlined_call_operand.vmem [shape: f32[4,16,16], index: 5, kind: input, shape index: {}]   ;;  %s4031_s6 = inlined_call_operand.vmem [shape: f32[4,16,16], index: 6, kind: input, shape index: {}]   ;;  %s4032_s7 = inlined_call_operand.vmem [shape: f32[128,32], index: 7, kind: output, shape index: {}]  }
   0x1   :  { %s3415_s26 = smov 0  }
   0x2 LB: > { %s29_s27 = sadd.s32 1, %s3349_s25  ;;  %p2802_p0 = scmp.ge.s32.totalorder %s3353_s26, 1  ;;  %s3353_s26 = sphi %s3415_s26, %s17_s26   ;;  %s3349_s25 = sphi %s3413_s25, %s4034_s25   ;;  %s3345_s24 = sphi %s3411_s24, %s4033_s24  }
   0x3   : > { %p31_p1 = scmp.ge.s32.totalorder %s29_s27, 2  ;;  %p268_p2 = scmp.lt.s32.totalorder %s3353_s26, 3 }
   0x5   : > { %s4036_s27 = smov (%p31_p1, %s29_s27), 0  ;;  %p269_p3 = pnand %p2802_p0, %p268_p2 }
   0x6   : > { %v3191_v0 = vld [vmem:[%s4026_s1] sm:$0xff] (!%p269_p3)   ;;  %s2803_s30 = sshll.u32 (!%p269_p3), %s3345_s24, 3  ;;  %v3192_v1 = vld [vmem:[%s4026_s1 + $0x8] sm:$0xff] (!%p269_p3)   ;;  %vm367_vm0 = vcmask (!%p269_p3), 261120   ;;  %v3355_v14 = vmov (!%p269_p3), 0.0   ;;  %vm3356_vm1 = vmmov (!%p269_p3), 0  }
   0x7   : > { %272 = sbr.rel (%p269_p3) target bundleno = 3185 (0xc71), region = 48  ;;  %p310_p4 = scmp.lt.s32.totalorder (!%p269_p3), %s2803_s30, 15  ;;  %2931 = vmatprep.subr.bf16.mxu0 (!%p269_p3), %v3191_v0  ;;  %3147 = vmatprep.subr.bf16.mxu1 (!%p269_p3), %v3191_v0  ;;  %v2807_v16 = vld [vmem:[%s4027_s2] ss:$0 sm:$0xff] (!%p269_p3)  ;;  %vm468_vm2 = vcmask (!%p269_p3), 64512   ;;  %v446_v46 = vld [vmem:[%s4030_s5 + $0x8] sm:$0xff] (!%p269_p3) }
   0x8   : > { %2932 = vmatpush3.bf16.msra.mxu0 (!%p269_p3), %v3191_v0  ;;  %3149 = vmatpush3.bf16.msra.mxu1 (!%p269_p3), %v3191_v0  ;;  %s3357_s16 = smov (!%p269_p3), 96   ;;  %v445_v44 = vld [vmem:[%s4030_s5] sm:$0xff] (!%p269_p3)  ;;  %vm682_vm3 = vcmask (!%p269_p3), 130048   ;;  %v3512_v59 = vld [vmem:[%s4031_s6 + $0x8] sm:$0xff] (!%p269_p3)  ;;  %s3358_s19 = smov (!%p269_p3), 64   ;;  %vm1503_vm4 = vcmask (!%p269_p3), 130112  }
   0x9   : > { %2933 = vmatprep.subr.bf16.mxu0 (!%p269_p3), %v3192_v1  ;;  %3148 = vmatprep.subr.bf16.mxu1 (!%p269_p3), %v3192_v1  ;;  %v3501_v47 = vld [vmem:[%s4031_s6] sm:$0xff] (!%p269_p3)  ;;  %s3359_s20 = smov (!%p269_p3), 88   ;;  %s3360_s21 = smov (!%p269_p3), 120   ;;  %vm2044_vm5 = vcmask (!%p269_p3), 195712   ;;  %vm2585_vm6 = vcmask (!%p269_p3), 261312  }
   0xa   : > { %v3506_v51 = vld [vmem:[%s4031_s6 + $0x20] sm:$0xff] (!%p269_p3)  ;;  %s3361_s29 = smov (!%p269_p3), 56   ;;  %s3362_s8 = smov (!%p269_p3), 80  }
   0xb   : > { %s3363_s9 = smov (!%p269_p3), 112   ;;  %s3364_s15 = smov (!%p269_p3), 48  }
   0xc   : > { %2934 = vmatpush3.bf16.msra.mxu0 (!%p269_p3), %v3192_v1  ;;  %3150 = vmatpush3.bf16.msra.mxu1 (!%p269_p3), %v3192_v1  ;;  %s3366_s17 = smov (!%p269_p3), 104   ;;  %s3369_s22 = smov (!%p269_p3), 16  }
   0xd   : > { %2943 = vmatprep.subr.bf16.mxu1 (!%p269_p3), %v3355_v14  ;;  %2955 = vmatprep.subr.bf16.mxu0 (!%p269_p3), %v3355_v14  ;;  %s3370_s28 = smov (!%p269_p3), 24  }
   0xe   : > { %s4038_s30 = smov (!%p310_p4, %s2803_s30), 15 }
   0xf   : > { %s2804_s10 = sshll.u32 %s4038_s30, 3 }
  0x10   : > { %s313_s13 = scalar_lea.vmem %s4025_s0, %s2804_s10  ;;  %s328_s14 = scalar_lea.vmem %s4032_s7, %s2804_s10 }
  0x11   : > { %v332_v2 = vld [vmem:[%s313_s13] sm:$0xff]  ;;  %v333_v3 = vld [vmem:[%s313_s13 + $0x8] sm:$0xff]  ;;  %v334_v7 = vld [vmem:[%s313_s13 + $0x10] sm:$0xff] }
  0x12   : > { %v336_v4 = vld [vmem:[%s313_s13 + $0x20] sm:$0xff]  ;;  %v340_v5 = vpack.c.bf16 %v333_v3, %v332_v2  ;;  %v337_v6 = vld [vmem:[%s313_s13 + $0x28] sm:$0xff]  ;;  %v335_v8 = vld [vmem:[%s313_s13 + $0x18] sm:$0xff] }
  0x13   : > { %v342_v9 = vpack.c.bf16 %v337_v6, %v336_v4  ;;  %v341_v10 = vpack.c.bf16 %v335_v8, %v334_v7  ;;  %v338_v11 = vld [vmem:[%s313_s13 + $0x30] sm:$0xff]  ;;  %v339_v12 = vld [vmem:[%s313_s13 + $0x38] sm:$0xff] }
  0x14   : > { %2935 = vmatprep.mubr.msk.bf16.mxu0 %vm367_vm0, %v340_v5  ;;  %v343_v13 = vpack.c.bf16 %v339_v12, %v338_v11  ;;  %v3521_v2 = vld [vmem:[%s4031_s6 + $0x10] sm:$0xff]  ;;  %v3527_v7 = vld [vmem:[%s4031_s6 + $0x18] sm:$0xff] }
  0x15   : > { %2939 = vmatprep.mubr.msk.bf16.mxu1 %vm367_vm0, %v342_v9  ;;  %2936 = vmatmul.mubr.msk.bf16.vlgmr.msra.gmra.mrb[0].mxu0 %vm367_vm0, %v341_v10 }
  0x16   : > { %2940 = vmatmul.mubr.msk.bf16.vlgmr.msra.gmra.mrb[0].mxu1 %vm367_vm0, %v343_v13  ;;  %2957 = vmatprep.mubr.msk.bf16.mxu0 %vm3356_vm1, %v3355_v14 }
  0x17   : > { %2945 = vmatprep.mubr.msk.bf16.mxu1 %vm3356_vm1, %v3355_v14 }
  0xe8   : > { %v2937_v15 = vpop.f32.mrb[0].mxu0 }
  0xe9   : > { %v2941_v17 = vpop.f32.mrb[0].mxu1  ;;  %v414_v18 = vpop.f32.mrb[1].mxu0  ;;  %v423_v22 = vadd.f32 %v2937_v15, %v2807_v16  ;;  %v3535_v15 = vld [vmem:[%s4031_s6 + $0x28] sm:$0xff] }
  0xea   : > { %v439_v19 = vadd.f32 %v2941_v17, %v2807_v16  ;;  %v430_v20 = vpop.f32.mrb[1].mxu1  ;;  %v2938_v21 = vpop.f32.mrb[2].mxu0  ;;  %v415_v27 = vadd.f32 %v2807_v16, %v414_v18  ;;  %v3540_v17 = vld [vmem:[%s4031_s6 + $0x30] sm:$0xff] }
  0xeb   : > { %v431_v23 = vadd.f32 %v2807_v16, %v430_v20  ;;  %v426_v24 = vadd.f32 %v2938_v21, %v2807_v16  ;;  %v2942_v25 = vpop.f32.mrb[2].mxu1  ;;  %v417_v26 = vpop.f32.mrb[3].mxu0 }
  0xec   : > { %v442_v28 = vadd.f32 %v2942_v25, %v2807_v16  ;;  %v418_v29 = vadd.f32 %v2807_v16, %v417_v26  ;;  %v433_v30 = vpop.f32.mrb[3].mxu1 }
  0xed   : > { %v3456_v31 = vpack.c.bf16 %v426_v24, %v423_v22  ;;  %v434_v32 = vadd.f32 %v2807_v16, %v433_v30 }
  0xee   : > { %v3458_v33 = vpack.c.bf16 %v442_v28, %v439_v19  ;;  %v3460_v34 = vpack.c.bf16 %v418_v29, %v415_v27 }
  0xef   : > { %v3462_v35 = vpack.c.bf16 %v434_v32, %v431_v23  ;;  %v3547_v23 = vld [vmem:[%s4031_s6 + $0x38] sm:$0xff] }
  0xf0   : > { %466 = vrot.lane.b32.xlu0 %v3460_v34, %s3357_s16 }
  0xf1   : > { %567 = vrot.lane.b32.xlu1 %v3462_v35, %s3357_s16 }
  0xf4   : > { %517 = vrot.lane.b32.xlu0 %v3456_v31, %s3357_s16 }
  0xf5   : > { %617 = vrot.lane.b32.xlu1 %v3458_v33, %s3357_s16  ;;  %s3365_s16 = smov 72  }
 0x162   : > { %v467_v36 = vpop.permute.xlu0 %466 }
 0x163   : > { %v568_v37 = vpop.permute.xlu1 %567  ;;  %v473_v38 = vsel %vm468_vm2, %v467_v36, 0 }
 0x164   : > { %v573_v39 = vsel %vm468_vm2, %v568_v37, 0  ;;  %2944 = vmatpush3.bf16.xpose.msra.mxu1 %v473_v38 }
 0x165   : > { %2956 = vmatpush3.bf16.xpose.msra.mxu0 %v573_v39  ;;  %2949 = vmatprep.subr.bf16.mxu1 %v3355_v14 }
 0x166   : > { %2967 = vmatprep.subr.bf16.mxu0 %v3355_v14  ;;  %v518_v40 = vpop.permute.xlu0 %517 }
 0x167   : > { %v523_v41 = vsel %vm468_vm2, %v518_v40, 0  ;;  %v618_v42 = vpop.permute.xlu1 %617 }
 0x168   : > { %v623_v43 = vsel %vm468_vm2, %v618_v42, 0 }
 0x16b   : > { %2946 = vmatmul.mubr.msk.bf16.vlgmr.msra.gmra.mrb[4].mxu1 %vm468_vm2, %v3460_v34 }
 0x16c   : > { %2958 = vmatmul.mubr.msk.bf16.vlgmr.msra.gmra.mrb[4].mxu0 %vm468_vm2, %v3462_v35  ;;  %2950 = vmatpush3.bf16.xpose.msra.mxu1 %v523_v41 }
 0x16d   : > { %2951 = vmatprep.mubr.msk.bf16.mxu1 %vm3356_vm1, %v3355_v14  ;;  %2961 = vmatprep.subr.bf16.mxu1 %v3355_v14 }
 0x16e   : > { %2969 = vmatprep.mubr.msk.bf16.mxu0 %vm3356_vm1, %v3355_v14 }
 0x173   : > { %2952 = vmatmul.mubr.msk.bf16.vlgmr.msra.gmra.mrb[8].mxu1 %vm468_vm2, %v3456_v31 }
 0x174   : > { %2962 = vmatpush3.bf16.xpose.msra.mxu1 %v623_v43  ;;  %2963 = vmatprep.mubr.msk.bf16.mxu1 %vm3356_vm1, %v3355_v14 }
 0x175   : > { %2973 = vmatprep.subr.bf16.mxu1 %v3355_v14 }
 0x17b   : > { %2964 = vmatmul.mubr.msk.bf16.vlgmr.msra.gmra.mrb[12].mxu1 %vm468_vm2, %v3458_v33 }
 0x17c   : > { %2975 = vmatprep.mubr.msk.bf16.mxu1 %vm3356_vm1, %v3355_v14 }
 0x23e   : > { %v509_v45 = vpop.f32.mrb[4].mxu1 }
 0x23f   : > { %v666_v48 = vadd.f32 %v509_v45, %v445_v44  ;;  %v609_v49 = vpop.f32.mrb[4].mxu0  ;;  %v2947_v50 = vpop.f32.mrb[5].mxu1 }
 0x240   : > { %v670_v52 = vadd.f32 %v609_v49, %v445_v44  ;;  %v2959_v53 = vpop.f32.mrb[5].mxu0  ;;  %v512_v54 = vpop.f32.mrb[6].mxu1 }
 0x241   : > { %v667_v55 = vadd.f32 %v512_v54, %v446_v46  ;;  %v612_v56 = vpop.f32.mrb[6].mxu0  ;;  %v2948_v57 = vpop.f32.mrb[7].mxu1  ;;  %v674_v58 = vadd.f32 %v666_v48, %v3501_v47 }
 0x242   : > { %v2960_v60 = vpop.f32.mrb[7].mxu0  ;;  %v678_v61 = vadd.f32 %v670_v52, %v3506_v51  ;;  %v671_v11 = vadd.f32 %v612_v56, %v446_v46 }
 0x243   : > { %v683_v62 = vsel %vm682_vm3, %v674_v58, -inf  ;;  %v675_v0 = vadd.f32 %v667_v55, %v3512_v59 }
 0x244   : > { %v695_v63 = vsel %vm682_vm3, %v678_v61, -inf  ;;  %684 = vmax.xlane.f32.xlu0 %v683_v62  ;;  %v679_v21 = vadd.f32 %v671_v11, %v3535_v15 }
 0x245   : > { %696 = vmax.xlane.f32.xlu1 %v695_v63  ;;  %v686_v5 = vsel %vm682_vm3, %v675_v0, -inf }
 0x246   : > { %v559_v1 = vpop.f32.mrb[8].mxu1  ;;  %v698_v27 = vsel %vm682_vm3, %v679_v21, -inf }
 0x247   : > { %v668_v3 = vadd.f32 %v559_v1, %v445_v44  ;;  %v2953_v4 = vpop.f32.mrb[9].mxu1 }
 0x248   : > { %v562_v6 = vpop.f32.mrb[10].mxu1 }
 0x249   : > { %687 = vmax.xlane.f32.xlu1 %v686_v5  ;;  %v669_v8 = vadd.f32 %v562_v6, %v446_v46  ;;  %v2954_v9 = vpop.f32.mrb[11].mxu1  ;;  %v676_v10 = vadd.f32 %v668_v3, %v3521_v2 }
 0x24b   : > { %v689_v12 = vsel %vm682_vm3, %v676_v10, -inf  ;;  %v677_v13 = vadd.f32 %v669_v8, %v3527_v7 }
 0x24c   : > { %690 = vmax.xlane.f32.xlu0 %v689_v12 }
 0x24d   : > { %v692_v20 = vsel %vm682_vm3, %v677_v13, -inf }
 0x24e   : > { %v659_v16 = vpop.f32.mrb[12].mxu1 }
 0x24f   : > { %v672_v18 = vadd.f32 %v659_v16, %v445_v44  ;;  %v2965_v19 = vpop.f32.mrb[13].mxu1 }
 0x250   : > { %693 = vmax.xlane.f32.xlu0 %v692_v20  ;;  %v662_v22 = vpop.f32.mrb[14].mxu1 }
 0x251   : > { %v673_v24 = vadd.f32 %v662_v22, %v446_v46  ;;  %v2966_v25 = vpop.f32.mrb[15].mxu1  ;;  %v680_v26 = vadd.f32 %v672_v18, %v3540_v17 }
 0x253   : > { %v701_v28 = vsel %vm682_vm3, %v680_v26, -inf  ;;  %v681_v29 = vadd.f32 %v673_v24, %v3547_v23 }
 0x254   : > { %699 = vmax.xlane.f32.xlu0 %v698_v27  ;;  %702 = vmax.xlane.f32.xlu1 %v701_v28 }
 0x255   : > { %v704_v30 = vsel %vm682_vm3, %v681_v29, -inf }
 0x258   : > { %705 = vmax.xlane.f32.xlu0 %v704_v30 }
 0x265   : > { %775 = vrot.lane.b32.xlu1 %v3460_v34, %s3358_s19 }
 0x2d1   : > { %v685_v32 = vpop.xlane.xlu0 %684 }
 0x2d2   : > { %v697_v36 = vpop.xlane.xlu1 %696  ;;  %v707_v37 = vsub.f32 %v674_v58, %v685_v32 }
 0x2d3   : > { %v711_v38 = vsub.f32 %v678_v61, %v697_v36 }
 0x2d4   : > { %v715_v39 = vmul.f32 1.442695, %v707_v37 }
 0x2d5   : > { %v723_v40 = vmul.f32 1.442695, %v711_v38 }
 0x2d6   : > { %3195 = vpow2.f32 %v715_v39  ;;  %v688_v41 = vpop.xlane.xlu1 %687 }
 0x2d7   : > { %v708_v42 = vsub.f32 %v675_v0, %v688_v41  ;;  %3197 = vpow2.f32 %v723_v40 }
 0x2d9   : > { %v717_v43 = vmul.f32 1.442695, %v708_v42  ;;  %v691_v44 = vpop.xlane.xlu0 %690 }
 0x2da   : > { %v709_v45 = vsub.f32 %v676_v10, %v691_v44 }
 0x2db   : > { %3199 = vpow2.f32 %v717_v43 }
 0x2dc   : > { %v719_v46 = vmul.f32 1.442695, %v709_v45 }
 0x2dd   : > { %v694_v48 = vpop.xlane.xlu0 %693 }
 0x2de   : > { %3201 = vpow2.f32 %v719_v46  ;;  %v710_v50 = vsub.f32 %v677_v13, %v694_v48 }
 0x2e0   : > { %v3556_v49 = vpop.eup %3195  ;;  %v721_v60 = vmul.f32 1.442695, %v710_v50 }
 0x2e1   : > { %v703_v52 = vpop.xlane.xlu1 %702  ;;  %v700_v53 = vpop.xlane.xlu0 %699  ;;  %v731_v54 = vsel %vm682_vm3, %v3556_v49, 0.0 }
 0x2e2   : > { %v3560_v55 = vpop.eup %3197  ;;  %v712_v56 = vsub.f32 %v679_v21, %v700_v53  ;;  %732 = vadd.xlane.f32.xlu1 %v731_v54  ;;  %v713_v8 = vsub.f32 %v680_v26, %v703_v52 }
 0x2e3   : > { %v743_v62 = vsel %vm682_vm3, %v3560_v55, 0.0 }
 0x2e4   : > { %v725_v57 = vmul.f32 1.442695, %v712_v56  ;;  %v727_v9 = vmul.f32 1.442695, %v713_v8 }
 0x2e5   : > { %v3200_v58 = vpop.eup %3199  ;;  %v776_v61 = vpop.permute.xlu1 %775 }
 0x2e6   : > { %2968 = vmatpush3.bf16.msra.mxu0 %v776_v61  ;;  %v734_v63 = vsel %vm682_vm3, %v3200_v58, 0.0  ;;  %744 = vadd.xlane.f32.xlu1 %v743_v62  ;;  %3203 = vpow2.f32 %v725_v57  ;;  %v706_v10 = vpop.xlane.xlu0 %705 }
 0x2e7   : > { %735 = vadd.xlane.f32.xlu0 %v734_v63  ;;  %2979 = vmatprep.subr.bf16.mxu0 %v3355_v14  ;;  %3205 = vpow2.f32 %v721_v60  ;;  %v714_v11 = vsub.f32 %v681_v29, %v706_v10 }
 0x2e8   : > { %v3566_v0 = vpop.eup %3201  ;;  %3207 = vpow2.f32 %v727_v9 }
 0x2e9   : > { %v737_v1 = vsel %vm682_vm3, %v3566_v0, 0.0  ;;  %v729_v12 = vmul.f32 1.442695, %v714_v11 }
 0x2ea   : > { %738 = vadd.xlane.f32.xlu1 %v737_v1 }
 0x2eb   : > { %3209 = vpow2.f32 %v729_v12 }
 0x2f0   : > { %v3204_v3 = vpop.eup %3203 }
 0x2f1   : > { %v746_v4 = vsel %vm682_vm3, %v3204_v3, 0.0  ;;  %v3571_v5 = vpop.eup %3205 }
 0x2f2   : > { %747 = vadd.xlane.f32.xlu0 %v746_v4  ;;  %v740_v6 = vsel %vm682_vm3, %v3571_v5, 0.0  ;;  %v3581_v13 = vpop.eup %3207 }
 0x2f3   : > { %v749_v16 = vsel %vm682_vm3, %v3581_v13, 0.0 }
 0x2f5   : > { %v3585_v18 = vpop.eup %3209 }
 0x2f6   : > { %741 = vadd.xlane.f32.xlu0 %v740_v6  ;;  %v752_v19 = vsel %vm682_vm3, %v3585_v18, 0.0 }
 0x2fb   : > { %869 = vrot.lane.b32.xlu1 %v3462_v35, %s3358_s19 }
 0x2ff   : > { %916 = vrot.lane.b32.xlu1 %v3458_v33, %s3358_s19 }
 0x30c   : > { %822 = vrot.lane.b32.xlu0 %v3456_v31, %s3358_s19 }
 0x323   : > { %750 = vadd.xlane.f32.xlu1 %v749_v16 }
 0x32b   : > { %753 = vadd.xlane.f32.xlu0 %v752_v19 }
 0x334   : > { %1024 = vrot.lane.b32.xlu1 %v3456_v31, %s3359_s20 }
 0x338   : > { %1075 = vrot.lane.b32.xlu1 %v3462_v35, %s3359_s20 }
 0x33c   : > { %1126 = vrot.lane.b32.xlu1 %v3458_v33, %s3359_s20 }
 0x340   : > { %1124 = vrot.lane.b32.xlu1 %v3458_v33, %s3360_s21 }
 0x341   : > { %973 = vrot.lane.b32.xlu0 %v3460_v34, %s3359_s20  ;;  %s3367_s20 = smov 40  }
 0x345   : > { %971 = vrot.lane.b32.xlu0 %v3460_v34, %s3360_s21 }
 0x349   : > { %1022 = vrot.lane.b32.xlu0 %v3456_v31, %s3360_s21 }
 0x34d   : > { %1073 = vrot.lane.b32.xlu0 %v3462_v35, %s3360_s21  ;;  %s3368_s21 = smov 8  }
 0x36f   : > { %v733_v20 = vpop.xlane.xlu1 %732 }
 0x370   : > { %3211 = vrcp.f32 %v733_v20 }
 0x373   : > { %v745_v22 = vpop.xlane.xlu1 %744 }
 0x374   : > { %v736_v21 = vpop.xlane.xlu0 %735 }
 0x375   : > { %3213 = vrcp.f32 %v736_v21 }
 0x376   : > { %3215 = vrcp.f32 %v745_v22 }
 0x377   : > { %v739_v25 = vpop.xlane.xlu1 %738 }
 0x37a   : > { %v3212_v24 = vpop.eup %3211 }
 0x37b   : > { %v763_v27 = vmul.f32 %v3212_v24, %v3556_v49  ;;  %v870_v32 = vpop.permute.xlu1 %869 }
 0x37f   : > { %v3214_v26 = vpop.eup %3213  ;;  %v748_v29 = vpop.xlane.xlu0 %747 }
 0x380   : > { %v764_v28 = vmul.f32 %v3214_v26, %v3200_v58  ;;  %3217 = vrcp.f32 %v748_v29  ;;  %v3216_v38 = vpop.eup %3215  ;;  %v917_v49 = vpop.permute.xlu1 %916 }
 0x381   : > { %3219 = vrcp.f32 %v739_v25  ;;  %v767_v40 = vmul.f32 %v3216_v38, %v3560_v55  ;;  %v447_v25 = vld [vmem:[%s4030_s5 + $0x10] sm:$0xff] }
 0x382   : > { %v771_v30 = vpack.c.bf16 %v764_v28, %v763_v27  ;;  %v448_v27 = vld [vmem:[%s4030_s5 + $0x18] sm:$0xff] }
 0x383   : > { %v742_v36 = vpop.xlane.xlu0 %741 }
 0x384   : > { %2970 = vmatmul.mubr.msk.bf16.vlgmr.msra.gmra.mrb[8].mxu0 %vm682_vm3, %v771_v30  ;;  %3221 = vrcp.f32 %v742_v36 }
 0x385   : > { %2980 = vmatpush3.bf16.msra.mxu0 %v870_v32  ;;  %2981 = vmatprep.mubr.msk.bf16.mxu0 %vm3356_vm1, %v3355_v14 }
 0x386   : > { %2991 = vmatprep.subr.bf16.mxu0 %v3355_v14 }
 0x387   : > { %v823_v37 = vpop.permute.xlu0 %822 }
 0x388   : > { %2974 = vmatpush3.bf16.msra.mxu1 %v823_v37 }
 0x389   : > { %2985 = vmatprep.subr.bf16.mxu1 %v3355_v14 }
 0x38a   : > { %v3218_v39 = vpop.eup %3217 }
 0x38b   : > { %v768_v41 = vmul.f32 %v3218_v39, %v3204_v3  ;;  %v3220_v42 = vpop.eup %3219 }
 0x38c   : > { %v765_v45 = vmul.f32 %v3220_v42, %v3566_v0 }
 0x38d   : > { %v773_v43 = vpack.c.bf16 %v768_v41, %v767_v40 }
 0x38e   : > { %v3222_v44 = vpop.eup %3221 }
 0x38f   : > { %v766_v46 = vmul.f32 %v3222_v44, %v3571_v5  ;;  %2982 = vmatmul.mubr.msk.bf16.vlgmr.msra.gmra.mrb[12].mxu0 %vm682_vm3, %v773_v43 }
 0x390   : > { %2993 = vmatprep.mubr.msk.bf16.mxu0 %vm3356_vm1, %v3355_v14 }
 0x391   : > { %v772_v48 = vpack.c.bf16 %v766_v46, %v765_v45 }
 0x393   : > { %2976 = vmatmul.mubr.msk.bf16.vlgmr.msra.gmra.mrb[16].mxu1 %vm682_vm3, %v772_v48 }
 0x394   : > { %2986 = vmatpush3.bf16.msra.mxu1 %v917_v49  ;;  %2987 = vmatprep.mubr.msk.bf16.mxu1 %vm3356_vm1, %v3355_v14 }
 0x395   : > { %2997 = vmatprep.subr.bf16.mxu1 %v3355_v14 }
 0x3b0   : > { %v751_v50 = vpop.xlane.xlu1 %750 }
 0x3b1   : > { %3223 = vrcp.f32 %v751_v50 }
 0x3b4   : > { %v1025_v53 = vpop.permute.xlu1 %1024 }
 0x3b5   : > { %v1030_v3 = vsel %vm468_vm2, %v1025_v53, 0 }
 0x3b8   : > { %v754_v52 = vpop.xlane.xlu0 %753  ;;  %v1076_v58 = vpop.permute.xlu1 %1075 }
 0x3b9   : > { %3225 = vrcp.f32 %v754_v52  ;;  %v1081_v63 = vsel %vm468_vm2, %v1076_v58, 0 }
 0x3bb   : > { %v3224_v57 = vpop.eup %3223 }
 0x3bc   : > { %v974_v54 = vpop.permute.xlu0 %973  ;;  %v769_v61 = vmul.f32 %v3224_v57, %v3581_v13  ;;  %v1127_v5 = vpop.permute.xlu1 %1126 }
 0x3bd   : > { %v979_v55 = vsel %vm468_vm2, %v974_v54, 0  ;;  %v1132_v6 = vsel %vm468_vm2, %v1127_v5, 0 }
 0x3be   : > { %2992 = vmatpush3.bf16.xpose.msra.mxu0 %v979_v55 }
 0x3bf   : > { %3003 = vmatprep.subr.bf16.mxu0 %v3355_v14 }
 0x3c0   : > { %v972_v56 = vpop.permute.xlu0 %971  ;;  %v1125_v8 = vpop.permute.xlu1 %1124 }
 0x3c3   : > { %v3226_v60 = vpop.eup %3225 }
 0x3c4   : > { %v770_v62 = vmul.f32 %v3226_v60, %v3585_v18  ;;  %v1023_v0 = vpop.permute.xlu0 %1022 }
 0x3c5   : > { %2994 = vmatmul.mubr.msk.bf16.vlgmr.msra.gmra.mrb[16].mxu0 %vm468_vm2, %v972_v56 }
 0x3c6   : > { %3004 = vmatpush3.bf16.xpose.msra.mxu0 %v1081_v63  ;;  %v774_v1 = vpack.c.bf16 %v770_v62, %v769_v61  ;;  %3005 = vmatprep.mubr.msk.bf16.mxu0 %vm3356_vm1, %v3355_v14 }
 0x3c7   : > { %3015 = vmatprep.subr.bf16.mxu0 %v3355_v14 }
 0x3c8   : > { %2988 = vmatmul.mubr.msk.bf16.vlgmr.msra.gmra.mrb[20].mxu1 %vm682_vm3, %v774_v1  ;;  %v1074_v4 = vpop.permute.xlu0 %1073 }
 0x3c9   : > { %2998 = vmatpush3.bf16.xpose.msra.mxu1 %v1030_v3  ;;  %2999 = vmatprep.mubr.msk.bf16.mxu1 %vm3356_vm1, %v3355_v14 }
 0x3ca   : > { %3009 = vmatprep.subr.bf16.mxu1 %v3355_v14 }
 0x3cd   : > { %3006 = vmatmul.mubr.msk.bf16.vlgmr.msra.gmra.mrb[20].mxu0 %vm468_vm2, %v1074_v4 }
 0x3ce   : > { %3017 = vmatprep.mubr.msk.bf16.mxu0 %vm3356_vm1, %v3355_v14 }
 0x3d0   : > { %3000 = vmatmul.mubr.msk.bf16.vlgmr.msra.gmra.mrb[24].mxu1 %vm468_vm2, %v1023_v0 }
 0x3d1   : > { %3010 = vmatpush3.bf16.xpose.msra.mxu1 %v1132_v6  ;;  %3011 = vmatprep.mubr.msk.bf16.mxu1 %vm3356_vm1, %v3355_v14 }
 0x3d2   : > { %3021 = vmatprep.subr.bf16.mxu1 %v3355_v14 }
 0x3d8   : > { %3012 = vmatmul.mubr.msk.bf16.vlgmr.msra.gmra.mrb[28].mxu1 %vm468_vm2, %v1125_v8 }
 0x3d9   : > { %3023 = vmatprep.mubr.msk.bf16.mxu1 %vm3356_vm1, %v3355_v14 }
 0x457   : > { %v815_v9 = vpop.f32.mrb[8].mxu0 }
 0x458   : > { %963 = vst.msk [vmem:[#allocation2] sm:$0xff] %vm468_vm2, %v815_v9  ;;  %v2971_v10 = vpop.f32.mrb[9].mxu0 }
 0x459   : > { %v818_v11 = vpop.f32.mrb[10].mxu0 }
 0x45a   : > { %964 = vst.msk [vmem:[#allocation2 + $0x8] sm:$0xff] %vm468_vm2, %v818_v11  ;;  %v2972_v12 = vpop.f32.mrb[11].mxu0 }
 0x462   : > { %v909_v13 = vpop.f32.mrb[12].mxu0 }
 0x463   : > { %967 = vst.msk [vmem:[#allocation2 + $0x20] sm:$0xff] %vm468_vm2, %v909_v13  ;;  %v2983_v16 = vpop.f32.mrb[13].mxu0 }
 0x464   : > { %v912_v18 = vpop.f32.mrb[14].mxu0 }
 0x465   : > { %968 = vst.msk [vmem:[#allocation2 + $0x28] sm:$0xff] %vm468_vm2, %v912_v18  ;;  %v2984_v19 = vpop.f32.mrb[15].mxu0 }
 0x466   : > { %v862_v20 = vpop.f32.mrb[16].mxu1 }
 0x467   : > { %965 = vst.msk [vmem:[#allocation2 + $0x10] sm:$0xff] %vm468_vm2, %v862_v20  ;;  %v2977_v21 = vpop.f32.mrb[17].mxu1 }
 0x468   : > { %v865_v22 = vpop.f32.mrb[18].mxu1 }
 0x469   : > { %966 = vst.msk [vmem:[#allocation2 + $0x18] sm:$0xff] %vm468_vm2, %v865_v22  ;;  %v2978_v24 = vpop.f32.mrb[19].mxu1 }
 0x498   : > { %v1015_v26 = vpop.f32.mrb[16].mxu0 }
 0x499   : > { %v1175_v28 = vadd.f32 %v1015_v26, %v447_v25  ;;  %v2995_v29 = vpop.f32.mrb[17].mxu0 }
 0x49a   : > { %v1018_v30 = vpop.f32.mrb[18].mxu0 }
 0x49b   : > { %v1176_v32 = vadd.f32 %v1018_v30, %v448_v27  ;;  %v956_v36 = vpop.f32.mrb[20].mxu1  ;;  %v2996_v37 = vpop.f32.mrb[19].mxu0  ;;  %v1183_v38 = vadd.f32 %v1175_v28, %v3501_v47 }
 0x49c   : > { %969 = vst.msk [vmem:[#allocation2 + $0x30] sm:$0xff] %vm468_vm2, %v956_v36  ;;  %v2989_v39 = vpop.f32.mrb[21].mxu1 }
 0x49d   : > { %v959_v40 = vpop.f32.mrb[22].mxu1  ;;  %v1191_v41 = vsel %vm682_vm3, %v1183_v38, -inf  ;;  %v1184_v42 = vadd.f32 %v1176_v32, %v3512_v59 }
 0x49e   : > { %970 = vst.msk [vmem:[#allocation2 + $0x38] sm:$0xff] %vm468_vm2, %v959_v40  ;;  %v2990_v43 = vpop.f32.mrb[23].mxu1  ;;  %1192 = vmax.xlane.f32.xlu0 %v1191_v41 }
 0x49f   : > { %v1194_v44 = vsel %vm682_vm3, %v1184_v42, -inf }
 0x4a0   : > { %1195 = vmax.xlane.f32.xlu1 %v1194_v44  ;;  %v1117_v45 = vpop.f32.mrb[20].mxu0 }
 0x4a1   : > { %v1179_v46 = vadd.f32 %v1117_v45, %v447_v25  ;;  %v3007_v48 = vpop.f32.mrb[21].mxu0 }
 0x4a2   : > { %v1120_v49 = vpop.f32.mrb[22].mxu0 }
 0x4a3   : > { %v1066_v50 = vpop.f32.mrb[24].mxu1  ;;  %v3008_v52 = vpop.f32.mrb[23].mxu0  ;;  %v1187_v53 = vadd.f32 %v1179_v46, %v3506_v51  ;;  %v1180_v62 = vadd.f32 %v1120_v49, %v448_v27 }
 0x4a4   : > { %v1177_v54 = vadd.f32 %v1066_v50, %v447_v25  ;;  %v3001_v55 = vpop.f32.mrb[25].mxu1 }
 0x4a5   : > { %v1069_v56 = vpop.f32.mrb[26].mxu1  ;;  %v1203_v57 = vsel %vm682_vm3, %v1187_v53, -inf  ;;  %v1188_v6 = vadd.f32 %v1180_v62, %v3535_v15 }
 0x4a6   : > { %v1178_v58 = vadd.f32 %v1069_v56, %v448_v27  ;;  %v3002_v60 = vpop.f32.mrb[27].mxu1  ;;  %1204 = vmax.xlane.f32.xlu1 %v1203_v57  ;;  %v1185_v61 = vadd.f32 %v1177_v54, %v3521_v2 }
 0x4a7   : > { %v1206_v13 = vsel %vm682_vm3, %v1188_v6, -inf }
 0x4a8   : > { %v1197_v63 = vsel %vm682_vm3, %v1185_v61, -inf  ;;  %v1186_v0 = vadd.f32 %v1178_v58, %v3527_v7 }
 0x4a9   : > { %1198 = vmax.xlane.f32.xlu0 %v1197_v63 }
 0x4aa   : > { %v1200_v5 = vsel %vm682_vm3, %v1186_v0, -inf }
 0x4ab   : > { %v1168_v1 = vpop.f32.mrb[28].mxu1 }
 0x4ac   : > { %v1181_v3 = vadd.f32 %v1168_v1, %v447_v25  ;;  %v3013_v4 = vpop.f32.mrb[29].mxu1 }
 0x4ad   : > { %1201 = vmax.xlane.f32.xlu0 %v1200_v5  ;;  %v1171_v8 = vpop.f32.mrb[30].mxu1 }
 0x4ae   : > { %v1182_v9 = vadd.f32 %v1171_v8, %v448_v27  ;;  %v3014_v10 = vpop.f32.mrb[31].mxu1  ;;  %v1189_v11 = vadd.f32 %v1181_v3, %v3540_v17 }
 0x4b0   : > { %v1209_v12 = vsel %vm682_vm3, %v1189_v11, -inf  ;;  %v1190_v16 = vadd.f32 %v1182_v9, %v3547_v23 }
 0x4b1   : > { %1210 = vmax.xlane.f32.xlu1 %v1209_v12  ;;  %1207 = vmax.xlane.f32.xlu0 %v1206_v13 }
 0x4b2   : > { %v1212_v18 = vsel %vm682_vm3, %v1190_v16, -inf }
 0x4b5   : > { %1213 = vmax.xlane.f32.xlu0 %v1212_v18 }
 0x4c2   : > { %1283 = vrot.lane.b32.xlu1 %v3460_v34, %s3361_s29 }
 0x4c6   : > { %1377 = vrot.lane.b32.xlu1 %v3462_v35, %s3361_s29 }
 0x4ca   : > { %1424 = vrot.lane.b32.xlu1 %v3458_v33, %s3361_s29 }
 0x4cb   : > { %1330 = vrot.lane.b32.xlu0 %v3456_v31, %s3361_s29 }
 0x52b   : > { %v1193_v19 = vpop.xlane.xlu0 %1192 }
 0x52c   : > { %v1215_v20 = vsub.f32 %v1183_v38, %v1193_v19 }
 0x52d   : > { %v1196_v21 = vpop.xlane.xlu1 %1195 }
 0x52e   : > { %v1223_v22 = vmul.f32 1.442695, %v1215_v20  ;;  %v1216_v24 = vsub.f32 %v1184_v42, %v1196_v21 }
 0x530   : > { %3227 = vpow2.f32 %v1223_v22  ;;  %v1225_v25 = vmul.f32 1.442695, %v1216_v24 }
 0x532   : > { %3229 = vpow2.f32 %v1225_v25 }
 0x533   : > { %v1205_v26 = vpop.xlane.xlu1 %1204 }
 0x534   : > { %v1219_v27 = vsub.f32 %v1187_v53, %v1205_v26 }
 0x536   : > { %v1199_v28 = vpop.xlane.xlu0 %1198  ;;  %v1231_v30 = vmul.f32 1.442695, %v1219_v27 }
 0x537   : > { %v1217_v29 = vsub.f32 %v1185_v61, %v1199_v28 }
 0x539   : > { %v1227_v32 = vmul.f32 1.442695, %v1217_v29 }
 0x53a   : > { %v3672_v36 = vpop.eup %3227  ;;  %v1202_v37 = vpop.xlane.xlu0 %1201 }
 0x53b   : > { %3231 = vpow2.f32 %v1227_v32  ;;  %v1218_v39 = vsub.f32 %v1186_v0, %v1202_v37  ;;  %v1239_v38 = vsel %vm682_vm3, %v3672_v36, 0.0 }
 0x53c   : > { %v3676_v40 = vpop.eup %3229  ;;  %1240 = vadd.xlane.f32.xlu1 %v1239_v38  ;;  %3233 = vpow2.f32 %v1231_v30 }
 0x53d   : > { %v1229_v41 = vmul.f32 1.442695, %v1218_v39  ;;  %v1242_v42 = vsel %vm682_vm3, %v3676_v40, 0.0 }
 0x53e   : > { %v1211_v43 = vpop.xlane.xlu1 %1210  ;;  %1243 = vadd.xlane.f32.xlu0 %v1242_v42  ;;  %v1208_v44 = vpop.xlane.xlu0 %1207 }
 0x53f   : > { %3235 = vpow2.f32 %v1229_v41  ;;  %v1221_v45 = vsub.f32 %v1189_v11, %v1211_v43  ;;  %v1220_v46 = vsub.f32 %v1188_v6, %v1208_v44 }
 0x541   : > { %v1235_v48 = vmul.f32 1.442695, %v1221_v45  ;;  %v1233_v49 = vmul.f32 1.442695, %v1220_v46 }
 0x542   : > { %v1284_v50 = vpop.permute.xlu1 %1283  ;;  %v1214_v52 = vpop.xlane.xlu0 %1213 }
 0x543   : > { %3237 = vpow2.f32 %v1235_v48  ;;  %v1222_v53 = vsub.f32 %v1190_v16, %v1214_v52  ;;  %3016 = vmatpush3.bf16.msra.mxu0 %v1284_v50 }
 0x544   : > { %3239 = vpow2.f32 %v1233_v49  ;;  %3027 = vmatprep.subr.bf16.mxu0 %v3355_v14 }
 0x545   : > { %v3232_v54 = vpop.eup %3231  ;;  %v1237_v55 = vmul.f32 1.442695, %v1222_v53 }
 0x546   : > { %v1331_v56 = vpop.permute.xlu0 %1330  ;;  %v1245_v57 = vsel %vm682_vm3, %v3232_v54, 0.0  ;;  %v3682_v58 = vpop.eup %3233 }
 0x547   : > { %3241 = vpow2.f32 %v1237_v55  ;;  %1246 = vadd.xlane.f32.xlu1 %v1245_v57  ;;  %3022 = vmatpush3.bf16.msra.mxu1 %v1331_v56  ;;  %v1251_v61 = vsel %vm682_vm3, %v3682_v58, 0.0  ;;  %v1378_v6 = vpop.permute.xlu1 %1377 }
 0x548   : > { %3033 = vmatprep.subr.bf16.mxu1 %v3355_v14 }
 0x549   : > { %v3236_v60 = vpop.eup %3235 }
 0x54a   : > { %v1248_v62 = vsel %vm682_vm3, %v3236_v60, 0.0 }
 0x54b   : > { %1252 = vadd.xlane.f32.xlu1 %v1251_v61  ;;  %1249 = vadd.xlane.f32.xlu0 %v1248_v62  ;;  %v1425_v8 = vpop.permute.xlu1 %1424 }
 0x54d   : > { %v3688_v63 = vpop.eup %3237 }
 0x54e   : > { %v3240_v0 = vpop.eup %3239  ;;  %v1257_v1 = vsel %vm682_vm3, %v3688_v63, 0.0 }
 0x54f   : > { %1258 = vadd.xlane.f32.xlu1 %v1257_v1  ;;  %v1254_v3 = vsel %vm682_vm3, %v3240_v0, 0.0 }
 0x550   : > { %1255 = vadd.xlane.f32.xlu0 %v1254_v3 }
 0x551   : > { %v3242_v4 = vpop.eup %3241 }
 0x552   : > { %v1260_v5 = vsel %vm682_vm3, %v3242_v4, 0.0 }
 0x554   : > { %1261 = vadd.xlane.f32.xlu0 %v1260_v5 }
 0x560   : > { %1565 = vrot.lane.b32.xlu1 %v3456_v31, %s3362_s8 }
 0x564   : > { %1616 = vrot.lane.b32.xlu1 %v3462_v35, %s3362_s8 }
 0x568   : > { %1667 = vrot.lane.b32.xlu1 %v3458_v33, %s3362_s8 }
 0x56a   : > { %1514 = vrot.lane.b32.xlu0 %v3460_v34, %s3362_s8 }
 0x56c   : > { %1665 = vrot.lane.b32.xlu1 %v3458_v33, %s3363_s9 }
 0x56e   : > { %1512 = vrot.lane.b32.xlu0 %v3460_v34, %s3363_s9 }
 0x572   : > { %1563 = vrot.lane.b32.xlu0 %v3456_v31, %s3363_s9 }
 0x576   : > { %1614 = vrot.lane.b32.xlu0 %v3462_v35, %s3363_s9 }
 0x5c9   : > { %v1241_v9 = vpop.xlane.xlu1 %1240 }
 0x5ca   : > { %3243 = vrcp.f32 %v1241_v9 }
 0x5cb   : > { %v1244_v10 = vpop.xlane.xlu0 %1243 }
 0x5cc   : > { %3245 = vrcp.f32 %v1244_v10 }
 0x5d4   : > { %v3244_v11 = vpop.eup %3243  ;;  %v1247_v12 = vpop.xlane.xlu1 %1246 }
 0x5d5   : > { %v1271_v16 = vmul.f32 %v3244_v11, %v3672_v36  ;;  %3247 = vrcp.f32 %v1247_v12 }
 0x5d6   : > { %v3246_v13 = vpop.eup %3245 }
 0x5d7   : > { %v1272_v18 = vmul.f32 %v3246_v13, %v3676_v40  ;;  %v449_v13 = vld [vmem:[%s4030_s5 + $0x20] sm:$0xff] }
 0x5d8   : > { %v1253_v19 = vpop.xlane.xlu1 %1252  ;;  %v1250_v20 = vpop.xlane.xlu0 %1249 }
 0x5d9   : > { %v1279_v21 = vpack.c.bf16 %v1272_v18, %v1271_v16  ;;  %3249 = vrcp.f32 %v1250_v20 }
 0x5da   : > { %3251 = vrcp.f32 %v1253_v19  ;;  %v450_v19 = vld [vmem:[%s4030_s5 + $0x28] sm:$0xff] }
 0x5db   : > { %3018 = vmatmul.mubr.msk.bf16.vlgmr.msra.gmra.mrb[24].mxu0 %vm682_vm3, %v1279_v21 }
 0x5dc   : > { %3028 = vmatpush3.bf16.msra.mxu0 %v1378_v6  ;;  %3029 = vmatprep.mubr.msk.bf16.mxu0 %vm3356_vm1, %v3355_v14  ;;  %v1259_v22 = vpop.xlane.xlu1 %1258 }
 0x5dd   : > { %v1256_v24 = vpop.xlane.xlu0 %1255  ;;  %3039 = vmatprep.subr.bf16.mxu0 %v3355_v14 }
 0x5de   : > { %3253 = vrcp.f32 %v1256_v24 }
 0x5df   : > { %3255 = vrcp.f32 %v1259_v22  ;;  %v3248_v26 = vpop.eup %3247 }
 0x5e0   : > { %v1273_v28 = vmul.f32 %v3248_v26, %v3232_v54  ;;  %v1566_v41 = vpop.permute.xlu1 %1565 }
 0x5e1   : > { %v1262_v25 = vpop.xlane.xlu0 %1261  ;;  %v1571_v52 = vsel %vm468_vm2, %v1566_v41, 0 }
 0x5e2   : > { %3257 = vrcp.f32 %v1262_v25 }
 0x5e3   : > { %v3250_v27 = vpop.eup %3249 }
 0x5e4   : > { %v1274_v29 = vmul.f32 %v3250_v27, %v3236_v60  ;;  %v3252_v30 = vpop.eup %3251  ;;  %v1617_v50 = vpop.permute.xlu1 %1616 }
 0x5e5   : > { %v1275_v37 = vmul.f32 %v3252_v30, %v3682_v58  ;;  %v1515_v40 = vpop.permute.xlu0 %1514  ;;  %v1622_v53 = vsel %vm468_vm2, %v1617_v50, 0 }
 0x5e6   : > { %v1280_v32 = vpack.c.bf16 %v1274_v29, %v1273_v28  ;;  %v1520_v46 = vsel %vm468_vm2, %v1515_v40, 0 }
 0x5e8   : > { %v3254_v36 = vpop.eup %3253  ;;  %3024 = vmatmul.mubr.msk.bf16.vlgmr.msra.gmra.mrb[32].mxu1 %vm682_vm3, %v1280_v32  ;;  %v1668_v55 = vpop.permute.xlu1 %1667 }
 0x5e9   : > { %v1276_v39 = vmul.f32 %v3254_v36, %v3240_v0  ;;  %v3256_v38 = vpop.eup %3255  ;;  %3034 = vmatpush3.bf16.msra.mxu1 %v1425_v8  ;;  %3035 = vmatprep.mubr.msk.bf16.mxu1 %vm3356_vm1, %v3355_v14  ;;  %v1513_v49 = vpop.permute.xlu0 %1512  ;;  %v1673_v56 = vsel %vm468_vm2, %v1668_v55, 0 }
 0x5ea   : > { %3045 = vmatprep.subr.bf16.mxu1 %v3355_v14  ;;  %v1277_v44 = vmul.f32 %v3256_v38, %v3688_v63 }
 0x5eb   : > { %v1281_v42 = vpack.c.bf16 %v1276_v39, %v1275_v37 }
 0x5ec   : > { %v3258_v43 = vpop.eup %3257  ;;  %v1666_v58 = vpop.permute.xlu1 %1665 }
 0x5ed   : > { %v1278_v45 = vmul.f32 %v3258_v43, %v3242_v4  ;;  %3030 = vmatmul.mubr.msk.bf16.vlgmr.msra.gmra.mrb[28].mxu0 %vm682_vm3, %v1281_v42  ;;  %v1564_v54 = vpop.permute.xlu0 %1563 }
 0x5ee   : > { %3040 = vmatpush3.bf16.xpose.msra.mxu0 %v1520_v46  ;;  %3041 = vmatprep.mubr.msk.bf16.mxu0 %vm3356_vm1, %v3355_v14 }
 0x5ef   : > { %v1282_v48 = vpack.c.bf16 %v1278_v45, %v1277_v44  ;;  %3051 = vmatprep.subr.bf16.mxu0 %v3355_v14 }
 0x5f1   : > { %3036 = vmatmul.mubr.msk.bf16.vlgmr.msra.gmra.mrb[36].mxu1 %vm682_vm3, %v1282_v48  ;;  %v1615_v57 = vpop.permute.xlu0 %1614 }
 0x5f2   : > { %3047 = vmatprep.mubr.msk.bf16.mxu1 %vm3356_vm1, %v3355_v14  ;;  %3046 = vmatpush3.bf16.xpose.msra.mxu1 %v1571_v52 }
 0x5f3   : > { %3057 = vmatprep.subr.bf16.mxu1 %v3355_v14 }
 0x5f5   : > { %3042 = vmatmul.mubr.msk.bf16.vlgmr.msra.gmra.mrb[32].mxu0 %vm468_vm2, %v1513_v49 }
 0x5f6   : > { %3052 = vmatpush3.bf16.xpose.msra.mxu0 %v1622_v53  ;;  %3053 = vmatprep.mubr.msk.bf16.mxu0 %vm3356_vm1, %v3355_v14 }
 0x5f7   : > { %3063 = vmatprep.subr.bf16.mxu0 %v3355_v14 }
 0x5f9   : > { %3048 = vmatmul.mubr.msk.bf16.vlgmr.msra.gmra.mrb[40].mxu1 %vm468_vm2, %v1564_v54 }
 0x5fa   : > { %3058 = vmatpush3.bf16.xpose.msra.mxu1 %v1673_v56  ;;  %3059 = vmatprep.mubr.msk.bf16.mxu1 %vm3356_vm1, %v3355_v14 }
 0x5fb   : > { %3069 = vmatprep.subr.bf16.mxu1 %v3355_v14 }
 0x5fd   : > { %3054 = vmatmul.mubr.msk.bf16.vlgmr.msra.gmra.mrb[36].mxu0 %vm468_vm2, %v1615_v57 }
 0x5fe   : > { %3065 = vmatprep.mubr.msk.bf16.mxu0 %vm3356_vm1, %v3355_v14 }
 0x601   : > { %3060 = vmatmul.mubr.msk.bf16.vlgmr.msra.gmra.mrb[44].mxu1 %vm468_vm2, %v1666_v58 }
 0x602   : > { %3071 = vmatprep.mubr.msk.bf16.mxu1 %vm3356_vm1, %v3355_v14 }
 0x6ae   : > { %v3740_v60 = vpop.f32.mrb[24].mxu0 }
 0x6af   : > { %v3019_v61 = vpop.f32.mrb[25].mxu0 }
 0x6b0   : > { %v3742_v62 = vpop.f32.mrb[26].mxu0 }
 0x6b1   : > { %v3020_v63 = vpop.f32.mrb[27].mxu0 }
 0x6bb   : > { %v3744_v0 = vpop.f32.mrb[32].mxu1 }
 0x6bc   : > { %v3025_v1 = vpop.f32.mrb[33].mxu1 }
 0x6bd   : > { %v3746_v3 = vpop.f32.mrb[34].mxu1 }
 0x6be   : > { %v3026_v4 = vpop.f32.mrb[35].mxu1 }
 0x6c0   : > { %v3748_v5 = vpop.f32.mrb[28].mxu0 }
 0x6c1   : > { %v3031_v6 = vpop.f32.mrb[29].mxu0 }
 0x6c2   : > { %v3750_v8 = vpop.f32.mrb[30].mxu0 }
 0x6c3   : > { %v3032_v9 = vpop.f32.mrb[31].mxu0 }
 0x6c4   : > { %v3752_v10 = vpop.f32.mrb[36].mxu1 }
 0x6c5   : > { %v3037_v11 = vpop.f32.mrb[37].mxu1 }
 0x6c6   : > { %v3754_v12 = vpop.f32.mrb[38].mxu1 }
 0x6c7   : > { %v3038_v16 = vpop.f32.mrb[39].mxu1 }
 0x6c8   : > { %v1556_v18 = vpop.f32.mrb[32].mxu0 }
 0x6c9   : > { %v1716_v20 = vadd.f32 %v1556_v18, %v449_v13  ;;  %v3043_v21 = vpop.f32.mrb[33].mxu0 }
 0x6ca   : > { %v1559_v22 = vpop.f32.mrb[34].mxu0 }
 0x6cb   : > { %v1717_v24 = vadd.f32 %v1559_v22, %v450_v19  ;;  %v3044_v25 = vpop.f32.mrb[35].mxu0  ;;  %v1724_v26 = vadd.f32 %v1716_v20, %v3501_v47 }
 0x6cc   : > { %v1607_v27 = vpop.f32.mrb[40].mxu1 }
 0x6cd   : > { %v1732_v28 = vsel %vm682_vm3, %v1724_v26, -inf  ;;  %v1725_v29 = vadd.f32 %v1717_v24, %v3512_v59  ;;  %v1718_v30 = vadd.f32 %v1607_v27, %v449_v13  ;;  %v3049_v32 = vpop.f32.mrb[41].mxu1 }
 0x6ce   : > { %1733 = vmax.xlane.f32.xlu0 %v1732_v28  ;;  %v1610_v36 = vpop.f32.mrb[42].mxu1 }
 0x6cf   : > { %v1735_v37 = vsel %vm682_vm3, %v1725_v29, -inf  ;;  %v1719_v39 = vadd.f32 %v1610_v36, %v450_v19  ;;  %v3050_v38 = vpop.f32.mrb[43].mxu1  ;;  %v1726_v41 = vadd.f32 %v1718_v30, %v3521_v2 }
 0x6d0   : > { %1736 = vmax.xlane.f32.xlu1 %v1735_v37  ;;  %v1658_v40 = vpop.f32.mrb[36].mxu0 }
 0x6d1   : > { %v1720_v42 = vadd.f32 %v1658_v40, %v449_v13  ;;  %v3055_v43 = vpop.f32.mrb[37].mxu0  ;;  %v1738_v47 = vsel %vm682_vm3, %v1726_v41, -inf  ;;  %v1727_v45 = vadd.f32 %v1719_v39, %v3527_v7 }
 0x6d2   : > { %v1661_v44 = vpop.f32.mrb[38].mxu0  ;;  %1739 = vmax.xlane.f32.xlu0 %v1738_v47 }
 0x6d3   : > { %v1721_v59 = vadd.f32 %v1661_v44, %v450_v19  ;;  %v3056_v46 = vpop.f32.mrb[39].mxu0  ;;  %v1728_v48 = vadd.f32 %v1720_v42, %v3506_v51  ;;  %v1741_v54 = vsel %vm682_vm3, %v1727_v45, -inf }
 0x6d4   : > { %v1709_v49 = vpop.f32.mrb[44].mxu1 }
 0x6d5   : > { %v1744_v50 = vsel %vm682_vm3, %v1728_v48, -inf  ;;  %v1722_v52 = vadd.f32 %v1709_v49, %v449_v13  ;;  %v3061_v53 = vpop.f32.mrb[45].mxu1  ;;  %v1729_v2 = vadd.f32 %v1721_v59, %v3535_v15 }
 0x6d6   : > { %1745 = vmax.xlane.f32.xlu1 %v1744_v50  ;;  %1742 = vmax.xlane.f32.xlu0 %v1741_v54  ;;  %v1712_v55 = vpop.f32.mrb[46].mxu1 }
 0x6d7   : > { %v1723_v56 = vadd.f32 %v1712_v55, %v450_v19  ;;  %v3062_v57 = vpop.f32.mrb[47].mxu1  ;;  %v1730_v7 = vadd.f32 %v1722_v52, %v3540_v17  ;;  %v1747_v51 = vsel %vm682_vm3, %v1729_v2, -inf }
 0x6d9   : > { %v1750_v58 = vsel %vm682_vm3, %v1730_v7, -inf  ;;  %v1731_v61 = vadd.f32 %v1723_v56, %v3547_v23 }
 0x6da   : > { %1751 = vmax.xlane.f32.xlu1 %v1750_v58  ;;  %1748 = vmax.xlane.f32.xlu0 %v1747_v51 }
 0x6db   : > { %v1753_v63 = vsel %vm682_vm3, %v1731_v61, -inf }
 0x6de   : > { %1754 = vmax.xlane.f32.xlu0 %v1753_v63 }
 0x6eb   : > { %1824 = vrot.lane.b32.xlu1 %v3460_v34, %s3364_s15 }
 0x6ef   : > { %1918 = vrot.lane.b32.xlu1 %v3462_v35, %s3364_s15 }
 0x6f3   : > { %1965 = vrot.lane.b32.xlu1 %v3458_v33, %s3364_s15 }
 0x6f4   : > { %1871 = vrot.lane.b32.xlu0 %v3456_v31, %s3364_s15 }
 0x75b   : > { %v1734_v15 = vpop.xlane.xlu0 %1733 }
 0x75c   : > { %v1756_v17 = vsub.f32 %v1724_v26, %v1734_v15 }
 0x75d   : > { %v1737_v1 = vpop.xlane.xlu1 %1736 }
 0x75e   : > { %v1764_v4 = vmul.f32 1.442695, %v1756_v17  ;;  %v1757_v6 = vsub.f32 %v1725_v29, %v1737_v1 }
 0x75f   : > { %v1740_v9 = vpop.xlane.xlu0 %1739 }
 0x760   : > { %3259 = vpow2.f32 %v1764_v4  ;;  %v1766_v23 = vmul.f32 1.442695, %v1757_v6  ;;  %v1758_v11 = vsub.f32 %v1726_v41, %v1740_v9 }
 0x762   : > { %3261 = vpow2.f32 %v1766_v23  ;;  %v1768_v13 = vmul.f32 1.442695, %v1758_v11 }
 0x763   : > { %v1746_v16 = vpop.xlane.xlu1 %1745  ;;  %v1743_v19 = vpop.xlane.xlu0 %1742 }
 0x764   : > { %v1760_v18 = vsub.f32 %v1728_v48, %v1746_v16  ;;  %3263 = vpow2.f32 %v1768_v13  ;;  %v1759_v20 = vsub.f32 %v1727_v45, %v1743_v19 }
 0x766   : > { %v1772_v21 = vmul.f32 1.442695, %v1760_v18  ;;  %v1770_v22 = vmul.f32 1.442695, %v1759_v20 }
 0x767   : > { %v1752_v24 = vpop.xlane.xlu1 %1751  ;;  %v1749_v25 = vpop.xlane.xlu0 %1748 }
 0x768   : > { %3265 = vpow2.f32 %v1772_v21  ;;  %v1762_v26 = vsub.f32 %v1730_v7, %v1752_v24  ;;  %v1761_v27 = vsub.f32 %v1729_v2, %v1749_v25 }
 0x769   : > { %3267 = vpow2.f32 %v1770_v22 }
 0x76a   : > { %v3260_v28 = vpop.eup %3259  ;;  %v1776_v29 = vmul.f32 1.442695, %v1762_v26  ;;  %v1774_v30 = vmul.f32 1.442695, %v1761_v27 }
 0x76b   : > { %v1780_v32 = vsel %vm682_vm3, %v3260_v28, 0.0  ;;  %v1825_v37 = vpop.permute.xlu1 %1824  ;;  %v1755_v39 = vpop.xlane.xlu0 %1754 }
 0x76c   : > { %v3262_v36 = vpop.eup %3261  ;;  %1781 = vadd.xlane.f32.xlu1 %v1780_v32  ;;  %3269 = vpow2.f32 %v1776_v29  ;;  %v1763_v38 = vsub.f32 %v1731_v61, %v1755_v39  ;;  %3064 = vmatpush3.bf16.msra.mxu0 %v1825_v37 }
 0x76d   : > { %v1783_v40 = vsel %vm682_vm3, %v3262_v36, 0.0  ;;  %3271 = vpow2.f32 %v1774_v30  ;;  %3075 = vmatprep.subr.bf16.mxu0 %v3355_v14 }
 0x76e   : > { %1784 = vadd.xlane.f32.xlu0 %v1783_v40  ;;  %v3264_v41 = vpop.eup %3263  ;;  %v1778_v42 = vmul.f32 1.442695, %v1763_v38 }
 0x76f   : > { %v1872_v43 = vpop.permute.xlu0 %1871  ;;  %v1786_v47 = vsel %vm682_vm3, %v3264_v41, 0.0  ;;  %v1919_v2 = vpop.permute.xlu1 %1918 }
 0x770   : > { %3273 = vpow2.f32 %v1778_v42  ;;  %1787 = vadd.xlane.f32.xlu1 %v1786_v47  ;;  %3070 = vmatpush3.bf16.msra.mxu1 %v1872_v43 }
 0x771   : > { %3081 = vmatprep.subr.bf16.mxu1 %v3355_v14 }
 0x772   : > { %v3266_v44 = vpop.eup %3265 }
 0x773   : > { %v3268_v45 = vpop.eup %3267  ;;  %v1792_v59 = vsel %vm682_vm3, %v3266_v44, 0.0  ;;  %v1966_v55 = vpop.permute.xlu1 %1965 }
 0x774   : > { %v1789_v46 = vsel %vm682_vm3, %v3268_v45, 0.0  ;;  %1793 = vadd.xlane.f32.xlu1 %v1792_v59 }
 0x775   : > { %1790 = vadd.xlane.f32.xlu0 %v1789_v46 }
 0x776   : > { %v3789_v48 = vpop.eup %3269 }
 0x777   : > { %v3272_v49 = vpop.eup %3271  ;;  %v1798_v50 = vsel %vm682_vm3, %v3789_v48, 0.0 }
 0x778   : > { %1799 = vadd.xlane.f32.xlu1 %v1798_v50  ;;  %v1795_v52 = vsel %vm682_vm3, %v3272_v49, 0.0 }
 0x779   : > { %1796 = vadd.xlane.f32.xlu0 %v1795_v52 }
 0x77a   : > { %v3274_v53 = vpop.eup %3273 }
 0x77b   : > { %v1801_v54 = vsel %vm682_vm3, %v3274_v53, 0.0 }
 0x77d   : > { %1802 = vadd.xlane.f32.xlu0 %v1801_v54 }
 0x789   : > { %2106 = vrot.lane.b32.xlu1 %v3456_v31, %s3365_s16 }
 0x78d   : > { %2157 = vrot.lane.b32.xlu1 %v3462_v35, %s3365_s16 }
 0x791   : > { %2208 = vrot.lane.b32.xlu1 %v3458_v33, %s3365_s16 }
 0x793   : > { %2055 = vrot.lane.b32.xlu0 %v3460_v34, %s3365_s16 }
 0x795   : > { %2206 = vrot.lane.b32.xlu1 %v3458_v33, %s3366_s17 }
 0x797   : > { %2053 = vrot.lane.b32.xlu0 %v3460_v34, %s3366_s17 }
 0x79b   : > { %2104 = vrot.lane.b32.xlu0 %v3456_v31, %s3366_s17 }
 0x79f   : > { %2155 = vrot.lane.b32.xlu0 %v3462_v35, %s3366_s17 }
 0x7f9   : > { %v1782_v56 = vpop.xlane.xlu1 %1781 }
 0x7fa   : > { %3275 = vrcp.f32 %v1782_v56 }
 0x7fb   : > { %v1785_v57 = vpop.xlane.xlu0 %1784 }
 0x7fc   : > { %3277 = vrcp.f32 %v1785_v57 }
 0x7fd   : > { %v1788_v7 = vpop.xlane.xlu1 %1787 }
 0x7fe   : > { %3279 = vrcp.f32 %v1788_v7 }
 0x801   : > { %v1794_v58 = vpop.xlane.xlu1 %1793 }
 0x802   : > { %v1791_v51 = vpop.xlane.xlu0 %1790 }
 0x803   : > { %3281 = vrcp.f32 %v1791_v51  ;;  %v451_v51 = vld [vmem:[%s4030_s5 + $0x30] sm:$0xff] }
 0x804   : > { %v3276_v61 = vpop.eup %3275  ;;  %3283 = vrcp.f32 %v1794_v58 }
 0x805   : > { %v1812_v15 = vmul.f32 %v3276_v61, %v3260_v28  ;;  %v1800_v1 = vpop.xlane.xlu1 %1799 }
 0x806   : > { %v3278_v63 = vpop.eup %3277  ;;  %v1797_v4 = vpop.xlane.xlu0 %1796 }
 0x807   : > { %v1813_v17 = vmul.f32 %v3278_v63, %v3262_v36  ;;  %3285 = vrcp.f32 %v1797_v4 }
 0x808   : > { %3287 = vrcp.f32 %v1800_v1  ;;  %v3280_v9 = vpop.eup %3279 }
 0x809   : > { %v1820_v6 = vpack.c.bf16 %v1813_v17, %v1812_v15  ;;  %v1814_v13 = vmul.f32 %v3280_v9, %v3264_v41  ;;  %v2107_v26 = vpop.permute.xlu1 %2106  ;;  %v452_v15 = vld [vmem:[%s4030_s5 + $0x38] sm:$0xff]  ;;  %v3323_v9 = vld [vmem:[%s4031_s6] sm:$0xff] }
 0x80a   : > { %v1803_v23 = vpop.xlane.xlu0 %1802  ;;  %v2112_v38 = vsel %vm468_vm2, %v2107_v26, 0 }
 0x80b   : > { %3066 = vmatmul.mubr.msk.bf16.vlgmr.msra.gmra.mrb[40].mxu0 %vm682_vm3, %v1820_v6  ;;  %3289 = vrcp.f32 %v1803_v23 }
 0x80c   : > { %3076 = vmatpush3.bf16.msra.mxu0 %v1919_v2  ;;  %3077 = vmatprep.mubr.msk.bf16.mxu0 %vm3356_vm1, %v3355_v14 }
 0x80d   : > { %3087 = vmatprep.subr.bf16.mxu0 %v3355_v14  ;;  %v3282_v11 = vpop.eup %3281  ;;  %v2158_v39 = vpop.permute.xlu1 %2157 }
 0x80e   : > { %v1815_v16 = vmul.f32 %v3282_v11, %v3268_v45  ;;  %v3284_v18 = vpop.eup %3283  ;;  %v2056_v25 = vpop.permute.xlu0 %2055  ;;  %v2163_v40 = vsel %vm468_vm2, %v2158_v39, 0  ;;  %v3326_v39 = vld [vmem:[%s4031_s6 + $0x18] sm:$0xff] }
 0x80f   : > { %v1816_v21 = vmul.f32 %v3284_v18, %v3266_v44  ;;  %v2061_v32 = vsel %vm468_vm2, %v2056_v25, 0  ;;  %v3324_v18 = vld [vmem:[%s4031_s6 + $0x8] sm:$0xff] }
 0x810   : > { %v1821_v19 = vpack.c.bf16 %v1815_v16, %v1814_v13 }
 0x811   : > { %v3286_v20 = vpop.eup %3285  ;;  %v2209_v42 = vpop.permute.xlu1 %2208 }
 0x812   : > { %v1817_v22 = vmul.f32 %v3286_v20, %v3272_v49  ;;  %3072 = vmatmul.mubr.msk.bf16.vlgmr.msra.gmra.mrb[48].mxu1 %vm682_vm3, %v1821_v19  ;;  %v3288_v24 = vpop.eup %3287  ;;  %v2054_v37 = vpop.permute.xlu0 %2053  ;;  %v2214_v43 = vsel %vm468_vm2, %v2209_v42, 0  ;;  %v3327_v42 = vld [vmem:[%s4031_s6 + $0x20] sm:$0xff] }
 0x813   : > { %3082 = vmatpush3.bf16.msra.mxu1 %v1966_v55  ;;  %3083 = vmatprep.mubr.msk.bf16.mxu1 %vm3356_vm1, %v3355_v14  ;;  %v1818_v29 = vmul.f32 %v3288_v24, %v3789_v48 }
 0x814   : > { %v1822_v27 = vpack.c.bf16 %v1817_v22, %v1816_v21  ;;  %3093 = vmatprep.subr.bf16.mxu1 %v3355_v14 }
 0x815   : > { %v3290_v28 = vpop.eup %3289  ;;  %v2207_v44 = vpop.permute.xlu1 %2206 }
 0x816   : > { %v1819_v30 = vmul.f32 %v3290_v28, %v3274_v53  ;;  %3078 = vmatmul.mubr.msk.bf16.vlgmr.msra.gmra.mrb[44].mxu0 %vm682_vm3, %v1822_v27  ;;  %v2105_v41 = vpop.permute.xlu0 %2104  ;;  %v3325_v28 = vld [vmem:[%s4031_s6 + $0x10] sm:$0xff] }
 0x817   : > { %3088 = vmatpush3.bf16.xpose.msra.mxu0 %v2061_v32  ;;  %3089 = vmatprep.mubr.msk.bf16.mxu0 %vm3356_vm1, %v3355_v14 }
 0x818   : > { %v1823_v36 = vpack.c.bf16 %v1819_v30, %v1818_v29  ;;  %3099 = vmatprep.subr.bf16.mxu0 %v3355_v14 }
 0x81a   : > { %3084 = vmatmul.mubr.msk.bf16.vlgmr.msra.gmra.mrb[52].mxu1 %vm682_vm3, %v1823_v36  ;;  %v2156_v47 = vpop.permute.xlu0 %2155 }
 0x81b   : > { %3095 = vmatprep.mubr.msk.bf16.mxu1 %vm3356_vm1, %v3355_v14 }
 0x81c   : > { %3094 = vmatpush3.bf16.xpose.msra.mxu1 %v2112_v38 }
 0x81d   : > { %3105 = vmatprep.subr.bf16.mxu1 %v3355_v14 }
 0x81e   : > { %3090 = vmatmul.mubr.msk.bf16.vlgmr.msra.gmra.mrb[48].mxu0 %vm468_vm2, %v2054_v37 }
 0x81f   : > { %3100 = vmatpush3.bf16.xpose.msra.mxu0 %v2163_v40  ;;  %3101 = vmatprep.mubr.msk.bf16.mxu0 %vm3356_vm1, %v3355_v14 }
 0x820   : > { %3111 = vmatprep.subr.bf16.mxu0 %v3355_v14 }
 0x823   : > { %3096 = vmatmul.mubr.msk.bf16.vlgmr.msra.gmra.mrb[56].mxu1 %vm468_vm2, %v2105_v41 }
 0x824   : > { %3106 = vmatpush3.bf16.xpose.msra.mxu1 %v2214_v43  ;;  %3107 = vmatprep.mubr.msk.bf16.mxu1 %vm3356_vm1, %v3355_v14 }
 0x825   : > { %3117 = vmatprep.subr.bf16.mxu1 %v3355_v14 }
 0x826   : > { %3102 = vmatmul.mubr.msk.bf16.vlgmr.msra.gmra.mrb[52].mxu0 %vm468_vm2, %v2156_v47 }
 0x827   : > { %3113 = vmatprep.mubr.msk.bf16.mxu0 %vm3356_vm1, %v3355_v14 }
 0x82b   : > { %3108 = vmatmul.mubr.msk.bf16.vlgmr.msra.gmra.mrb[60].mxu1 %vm468_vm2, %v2207_v44 }
 0x82c   : > { %3119 = vmatprep.mubr.msk.bf16.mxu1 %vm3356_vm1, %v3355_v14 }
 0x8de   : > { %v3838_v45 = vpop.f32.mrb[40].mxu0 }
 0x8df   : > { %v3067_v59 = vpop.f32.mrb[41].mxu0 }
 0x8e0   : > { %v3840_v46 = vpop.f32.mrb[42].mxu0 }
 0x8e1   : > { %v3068_v48 = vpop.f32.mrb[43].mxu0 }
 0x8e5   : > { %v3842_v49 = vpop.f32.mrb[48].mxu1 }
 0x8e6   : > { %v3073_v50 = vpop.f32.mrb[49].mxu1 }
 0x8e7   : > { %v3844_v52 = vpop.f32.mrb[50].mxu1 }
 0x8e8   : > { %v3074_v53 = vpop.f32.mrb[51].mxu1 }
 0x8e9   : > { %v3846_v54 = vpop.f32.mrb[44].mxu0  ;;  %v3328_v53 = vld [vmem:[%s4031_s6 + $0x28] sm:$0xff] }
 0x8ea   : > { %v3079_v2 = vpop.f32.mrb[45].mxu0 }
 0x8eb   : > { %v3848_v55 = vpop.f32.mrb[46].mxu0 }
 0x8ec   : > { %v3080_v56 = vpop.f32.mrb[47].mxu0 }
 0x8ed   : > { %v3850_v57 = vpop.f32.mrb[52].mxu1 }
 0x8ee   : > { %v3085_v7 = vpop.f32.mrb[53].mxu1 }
 0x8ef   : > { %v3852_v58 = vpop.f32.mrb[54].mxu1 }
 0x8f0   : > { %v3086_v61 = vpop.f32.mrb[55].mxu1 }
 0x8f1   : > { %v2097_v63 = vpop.f32.mrb[48].mxu0 }
 0x8f2   : > { %v2257_v17 = vadd.f32 %v2097_v63, %v451_v51  ;;  %v3091_v1 = vpop.f32.mrb[49].mxu0  ;;  %v3329_v63 = vld [vmem:[%s4031_s6 + $0x30] sm:$0xff] }
 0x8f3   : > { %v2100_v4 = vpop.f32.mrb[50].mxu0 }
 0x8f4   : > { %v2258_v6 = vadd.f32 %v2100_v4, %v452_v15  ;;  %v3092_v23 = vpop.f32.mrb[51].mxu0  ;;  %v2265_v11 = vadd.f32 %v3323_v9, %v2257_v17  ;;  %v3330_v4 = vld [vmem:[%s4031_s6 + $0x38] sm:$0xff] }
 0x8f6   : > { %v2148_v13 = vpop.f32.mrb[56].mxu1  ;;  %v2273_v16 = vsel %vm682_vm3, %v2265_v11, -inf  ;;  %v2266_v19 = vadd.f32 %v3324_v18, %v2258_v6 }
 0x8f7   : > { %v2259_v20 = vadd.f32 %v2148_v13, %v451_v51  ;;  %v3097_v21 = vpop.f32.mrb[57].mxu1  ;;  %2274 = vmax.xlane.f32.xlu0 %v2273_v16 }
 0x8f8   : > { %v2151_v22 = vpop.f32.mrb[58].mxu1  ;;  %v2276_v24 = vsel %vm682_vm3, %v2266_v19, -inf }
 0x8f9   : > { %v2260_v25 = vadd.f32 %v2151_v22, %v452_v15  ;;  %v3098_v26 = vpop.f32.mrb[59].mxu1  ;;  %2277 = vmax.xlane.f32.xlu1 %v2276_v24  ;;  %v2199_v27 = vpop.f32.mrb[52].mxu0  ;;  %v2267_v29 = vadd.f32 %v3325_v28, %v2259_v20 }
 0x8fa   : > { %v2261_v30 = vadd.f32 %v2199_v27, %v451_v51  ;;  %v3103_v32 = vpop.f32.mrb[53].mxu0 }
 0x8fb   : > { %v2279_v36 = vsel %vm682_vm3, %v2267_v29, -inf  ;;  %v2202_v37 = vpop.f32.mrb[54].mxu0  ;;  %v2268_v38 = vadd.f32 %v3326_v39, %v2260_v25 }
 0x8fc   : > { %2280 = vmax.xlane.f32.xlu0 %v2279_v36  ;;  %v2262_v40 = vadd.f32 %v2202_v37, %v452_v15  ;;  %v3104_v41 = vpop.f32.mrb[55].mxu0  ;;  %v2269_v43 = vadd.f32 %v3327_v42, %v2261_v30 }
 0x8fd   : > { %v2282_v50 = vsel %vm682_vm3, %v2268_v38, -inf }
 0x8fe   : > { %v2250_v47 = vpop.f32.mrb[60].mxu1  ;;  %v2285_v44 = vsel %vm682_vm3, %v2269_v43, -inf  ;;  %v2270_v2 = vadd.f32 %v3328_v53, %v2262_v40 }
 0x8ff   : > { %v2263_v59 = vadd.f32 %v2250_v47, %v451_v51  ;;  %v3109_v48 = vpop.f32.mrb[61].mxu1  ;;  %2286 = vmax.xlane.f32.xlu1 %v2285_v44 }
 0x900   : > { %2283 = vmax.xlane.f32.xlu0 %v2282_v50  ;;  %v2253_v56 = vpop.f32.mrb[62].mxu1  ;;  %v2288_v1 = vsel %vm682_vm3, %v2270_v2, -inf }
 0x901   : > { %v2264_v7 = vadd.f32 %v2253_v56, %v452_v15  ;;  %v3110_v61 = vpop.f32.mrb[63].mxu1  ;;  %v2271_v17 = vadd.f32 %v3329_v63, %v2263_v59 }
 0x903   : > { %v2291_v51 = vsel %vm682_vm3, %v2271_v17, -inf  ;;  %v2272_v6 = vadd.f32 %v3330_v4, %v2264_v7 }
 0x904   : > { %2292 = vmax.xlane.f32.xlu1 %v2291_v51  ;;  %2289 = vmax.xlane.f32.xlu0 %v2288_v1 }
 0x905   : > { %v2294_v23 = vsel %vm682_vm3, %v2272_v6, -inf }
 0x908   : > { %2295 = vmax.xlane.f32.xlu0 %v2294_v23 }
 0x915   : > { %2365 = vrot.lane.b32.xlu1 %v3460_v34, %s3367_s20 }
 0x984   : > { %v2275_v15 = vpop.xlane.xlu0 %2274 }
 0x985   : > { %v2297_v9 = vsub.f32 %v2265_v11, %v2275_v15 }
 0x986   : > { %v2278_v13 = vpop.xlane.xlu1 %2277 }
 0x987   : > { %v2305_v16 = vmul.f32 1.442695, %v2297_v9  ;;  %v2298_v18 = vsub.f32 %v2266_v19, %v2278_v13 }
 0x989   : > { %3291 = vpow2.f32 %v2305_v16  ;;  %v2307_v20 = vmul.f32 1.442695, %v2298_v18  ;;  %v2281_v21 = vpop.xlane.xlu0 %2280 }
 0x98a   : > { %v2299_v22 = vsub.f32 %v2267_v29, %v2281_v21 }
 0x98b   : > { %3293 = vpow2.f32 %v2307_v20 }
 0x98c   : > { %v2309_v24 = vmul.f32 1.442695, %v2299_v22  ;;  %v2287_v25 = vpop.xlane.xlu1 %2286 }
 0x98d   : > { %v2301_v26 = vsub.f32 %v2269_v43, %v2287_v25  ;;  %v2284_v27 = vpop.xlane.xlu0 %2283 }
 0x98e   : > { %3295 = vpow2.f32 %v2309_v24  ;;  %v2300_v28 = vsub.f32 %v2268_v38, %v2284_v27 }
 0x98f   : > { %v2313_v30 = vmul.f32 1.442695, %v2301_v26 }
 0x990   : > { %v2311_v32 = vmul.f32 1.442695, %v2300_v28 }
 0x991   : > { %3297 = vpow2.f32 %v2313_v30  ;;  %v2293_v34 = vpop.xlane.xlu1 %2292  ;;  %v2290_v36 = vpop.xlane.xlu0 %2289 }
 0x992   : > { %3299 = vpow2.f32 %v2311_v32  ;;  %v2303_v11 = vsub.f32 %v2271_v17, %v2293_v34  ;;  %v2302_v37 = vsub.f32 %v2270_v2, %v2290_v36 }
 0x993   : > { %v3894_v19 = vpop.eup %3291 }
 0x994   : > { %v2317_v39 = vmul.f32 1.442695, %v2303_v11  ;;  %v2315_v40 = vmul.f32 1.442695, %v2302_v37  ;;  %v2321_v29 = vsel %vm682_vm3, %v3894_v19, 0.0 }
 0x995   : > { %v3898_v41 = vpop.eup %3293  ;;  %v2366_v42 = vpop.permute.xlu1 %2365  ;;  %2322 = vadd.xlane.f32.xlu1 %v2321_v29 }
 0x996   : > { %v2296_v43 = vpop.xlane.xlu0 %2295  ;;  %3301 = vpow2.f32 %v2317_v39  ;;  %3112 = vmatpush3.bf16.msra.mxu0 %v2366_v42  ;;  %v2324_v47 = vsel %vm682_vm3, %v3898_v41, 0.0  ;;  %v3193_v42 = vld [vmem:[%s4028_s3] sm:$0xff]  }
 0x997   : > { %v2304_v38 = vsub.f32 %v2272_v6, %v2296_v43  ;;  %3303 = vpow2.f32 %v2315_v40  ;;  %2325 = vadd.xlane.f32.xlu0 %v2324_v47  ;;  %3123 = vmatprep.subr.bf16.mxu0 %v3355_v14 }
 0x998   : > { %v3903_v44 = vpop.eup %3295 }
 0x999   : > { %v2319_v59 = vmul.f32 1.442695, %v2304_v38  ;;  %v2327_v48 = vsel %vm682_vm3, %v3903_v44, 0.0 }
 0x99a   : > { %2328 = vadd.xlane.f32.xlu1 %v2327_v48 }
 0x99b   : > { %3305 = vpow2.f32 %v2319_v59  ;;  %v3907_v50 = vpop.eup %3297 }
 0x99c   : > { %v3909_v53 = vpop.eup %3299  ;;  %v2333_v2 = vsel %vm682_vm3, %v3907_v50, 0.0 }
 0x99d   : > { %v2330_v56 = vsel %vm682_vm3, %v3909_v53, 0.0 }
 0x99e   : > { %2334 = vadd.xlane.f32.xlu1 %v2333_v2  ;;  %2331 = vadd.xlane.f32.xlu0 %v2330_v56 }
 0x9a0   : > { %v3915_v7 = vpop.eup %3301 }
 0x9a1   : > { %v3917_v61 = vpop.eup %3303  ;;  %v2339_v63 = vsel %vm682_vm3, %v3915_v7, 0.0 }
 0x9a2   : > { %2340 = vadd.xlane.f32.xlu1 %v2339_v63  ;;  %v2336_v17 = vsel %vm682_vm3, %v3917_v61, 0.0 }
 0x9a3   : > { %2337 = vadd.xlane.f32.xlu0 %v2336_v17 }
 0x9a5   : > { %v3923_v51 = vpop.eup %3305 }
 0x9a6   : > { %v2342_v1 = vsel %vm682_vm3, %v3923_v51, 0.0 }
 0x9a7   : > { %2343 = vadd.xlane.f32.xlu0 %v2342_v1 }
 0x9b3   : > { %2459 = vrot.lane.b32.xlu1 %v3462_v35, %s3367_s20 }
 0x9b7   : > { %2506 = vrot.lane.b32.xlu1 %v3458_v33, %s3367_s20 }
 0x9bb   : > { %1481 = vrot.lane.b32.xlu1 %v3742_v62, %s3368_s21 }
 0x9bd   : > { %2412 = vrot.lane.b32.xlu0 %v3456_v31, %s3367_s20 }
 0x9bf   : > { %1485 = vrot.lane.b32.xlu1 %v3746_v3, %s3368_s21 }
 0x9c1   : > { %1479 = vrot.lane.b32.xlu0 %v3740_v60, %s3368_s21 }
 0x9c3   : > { %2022 = vrot.lane.b32.xlu1 %v3840_v46, %s3369_s22 }
 0x9c5   : > { %1483 = vrot.lane.b32.xlu0 %v3744_v0, %s3368_s21 }
 0x9c7   : > { %2026 = vrot.lane.b32.xlu1 %v3844_v52, %s3369_s22 }
 0x9c9   : > { %2020 = vrot.lane.b32.xlu0 %v3838_v45, %s3369_s22 }
 0x9cb   : > { %1489 = vrot.lane.b32.xlu1 %v3750_v8, %s3368_s21 }
 0x9cd   : > { %2024 = vrot.lane.b32.xlu0 %v3842_v49, %s3369_s22 }
 0x9cf   : > { %1493 = vrot.lane.b32.xlu1 %v3754_v12, %s3368_s21 }
 0x9d1   : > { %1487 = vrot.lane.b32.xlu0 %v3748_v5, %s3368_s21 }
 0x9d3   : > { %2030 = vrot.lane.b32.xlu1 %v3848_v55, %s3369_s22 }
 0x9d5   : > { %1491 = vrot.lane.b32.xlu0 %v3752_v10, %s3368_s21 }
 0x9d7   : > { %2034 = vrot.lane.b32.xlu1 %v3852_v58, %s3369_s22 }
 0x9d9   : > { %2028 = vrot.lane.b32.xlu0 %v3846_v54, %s3369_s22 }
 0x9dd   : > { %2032 = vrot.lane.b32.xlu0 %v3850_v57, %s3369_s22 }
 0xa22   : > { %v2323_v31 = vpop.xlane.xlu1 %2322 }
 0xa23   : > { %3307 = vrcp.f32 %v2323_v31 }
 0xa24   : > { %v2326_v33 = vpop.xlane.xlu0 %2325 }
 0xa25   : > { %3309 = vrcp.f32 %v2326_v33 }
 0xa27   : > { %v2329_v35 = vpop.xlane.xlu1 %2328 }
 0xa28   : > { %3311 = vrcp.f32 %v2329_v35 }
 0xa2b   : > { %v2335_v60 = vpop.xlane.xlu1 %2334  ;;  %v2332_v62 = vpop.xlane.xlu0 %2331 }
 0xa2c   : > { %3313 = vrcp.f32 %v2332_v62 }
 0xa2d   : > { %v3308_v0 = vpop.eup %3307  ;;  %3315 = vrcp.f32 %v2335_v60 }
 0xa2e   : > { %v2353_v8 = vmul.f32 %v3308_v0, %v3894_v19 }
 0xa2f   : > { %v3310_v3 = vpop.eup %3309  ;;  %v2341_v5 = vpop.xlane.xlu1 %2340 }
 0xa30   : > { %v2354_v10 = vmul.f32 %v3310_v3, %v3898_v41  ;;  %v2338_v12 = vpop.xlane.xlu0 %2337 }
 0xa31   : > { %3317 = vrcp.f32 %v2338_v12 }
 0xa32   : > { %v2361_v45 = vpack.c.bf16 %v2354_v10, %v2353_v8  ;;  %3319 = vrcp.f32 %v2341_v5  ;;  %v3312_v52 = vpop.eup %3311 }
 0xa33   : > { %v2460_v46 = vpop.permute.xlu1 %2459  ;;  %v2355_v57 = vmul.f32 %v3312_v52, %v3903_v44  ;;  %v3194_v44 = vld [vmem:[%s4028_s3 + $0x8] sm:$0xff]  }
 0xa34   : > { %v2344_v49 = vpop.xlane.xlu0 %2343  ;;  %3114 = vmatmul.mubr.msk.bf16.vlgmr.msra.gmra.mrb[56].mxu0 %vm682_vm3, %v2361_v45 }
 0xa35   : > { %3321 = vrcp.f32 %v2344_v49  ;;  %3124 = vmatpush3.bf16.msra.mxu0 %v2460_v46  ;;  %3125 = vmatprep.mubr.msk.bf16.mxu0 %vm3356_vm1, %v3355_v14 }
 0xa36   : > { %v3314_v54 = vpop.eup %3313  ;;  %3135 = vmatprep.subr.bf16.mxu0 %v3193_v42 }
 0xa37   : > { %v2507_v55 = vpop.permute.xlu1 %2506  ;;  %v2356_v58 = vmul.f32 %v3314_v54, %v3909_v53  ;;  %v3316_v6 = vpop.eup %3315 }
 0xa38   : > { %v2413_v4 = vpop.permute.xlu0 %2412  ;;  %v2357_v13 = vmul.f32 %v3316_v6, %v3907_v50 }
 0xa39   : > { %3118 = vmatpush3.bf16.msra.mxu1 %v2413_v4  ;;  %v2362_v23 = vpack.c.bf16 %v2356_v58, %v2355_v57 }
 0xa3a   : > { %3129 = vmatprep.subr.bf16.mxu1 %v3355_v14 }
 0xa3b   : > { %v3318_v15 = vpop.eup %3317  ;;  %v1482_v9 = vpop.permute.xlu1 %1481 }
 0xa3c   : > { %v2358_v16 = vmul.f32 %v3318_v15, %v3917_v61  ;;  %1505 = vst.msk [vmem:[#allocation2 + $0x8] sm:$0xff] %vm1503_vm4, %v1482_v9  ;;  %3120 = vmatmul.mubr.msk.bf16.vlgmr.msra.gmra.mrb[64].mxu1 %vm682_vm3, %v2362_v23  ;;  %v1480_v18 = vpop.permute.xlu0 %1479  ;;  %v3320_v20 = vpop.eup %3319  ;;  %v2846_v23 = vld [vmem:[%s4029_s4] ss:$0 sm:$0xff] }
 0xa3d   : > { %1504 = vst.msk [vmem:[#allocation2] sm:$0xff] %vm1503_vm4, %v1480_v18  ;;  %3130 = vmatpush3.bf16.msra.mxu1 %v2507_v55  ;;  %3131 = vmatprep.mubr.msk.bf16.mxu1 %vm3356_vm1, %v3355_v14  ;;  %v2359_v25 = vmul.f32 %v3320_v20, %v3915_v7 }
 0xa3e   : > { %v2363_v21 = vpack.c.bf16 %v2358_v16, %v2357_v13 }
 0xa3f   : > { %v3322_v22 = vpop.eup %3321  ;;  %v1486_v24 = vpop.permute.xlu1 %1485 }
 0xa40   : > { %v2360_v26 = vmul.f32 %v3322_v22, %v3923_v51  ;;  %1507 = vst.msk [vmem:[#allocation2 + $0x18] sm:$0xff] %vm1503_vm4, %v1486_v24  ;;  %3126 = vmatmul.mubr.msk.bf16.vlgmr.msra.gmra.mrb[60].mxu0 %vm682_vm3, %v2363_v21  ;;  %v1484_v27 = vpop.permute.xlu0 %1483 }
 0xa41   : > { %1506 = vst.msk [vmem:[#allocation2 + $0x10] sm:$0xff] %vm1503_vm4, %v1484_v27  ;;  %3136 = vmatpush3.bf16.msra.mxu0 %v3193_v42 }
 0xa42   : > { %v2364_v28 = vpack.c.bf16 %v2360_v26, %v2359_v25  ;;  %3137 = vmatprep.subr.bf16.mxu0 %v3194_v44 }
 0xa43   : > { %v2023_v30 = vpop.permute.xlu1 %2022 }
 0xa44   : > { %2046 = vst.msk [vmem:[#allocation2 + $0x8] sm:$0xff] %vm2044_vm5, %v2023_v30  ;;  %3132 = vmatmul.mubr.msk.bf16.vlgmr.msra.gmra.mrb[68].mxu1 %vm682_vm3, %v2364_v28  ;;  %v2021_v14 = vpop.permute.xlu0 %2020 }
 0xa45   : > { %2045 = vst.msk [vmem:[#allocation2] sm:$0xff] %vm2044_vm5, %v2021_v14  ;;  %3138 = vmatpush3.bf16.msra.mxu0 %v3194_v44 }
 0xa47   : > { %v2027_v32 = vpop.permute.xlu1 %2026 }
 0xa48   : > { %2048 = vst.msk [vmem:[#allocation2 + $0x18] sm:$0xff] %vm2044_vm5, %v2027_v32  ;;  %v2025_v34 = vpop.permute.xlu0 %2024 }
 0xa49   : > { %2047 = vst.msk [vmem:[#allocation2 + $0x10] sm:$0xff] %vm2044_vm5, %v2025_v34 }
 0xa4b   : > { %v1490_v36 = vpop.permute.xlu1 %1489 }
 0xa4c   : > { %1509 = vst.msk [vmem:[#allocation2 + $0x28] sm:$0xff] %vm1503_vm4, %v1490_v36  ;;  %v1488_v11 = vpop.permute.xlu0 %1487 }
 0xa4d   : > { %1508 = vst.msk [vmem:[#allocation2 + $0x20] sm:$0xff] %vm1503_vm4, %v1488_v11 }
 0xa4f   : > { %v1494_v37 = vpop.permute.xlu1 %1493 }
 0xa50   : > { %1511 = vst.msk [vmem:[#allocation2 + $0x38] sm:$0xff] %vm1503_vm4, %v1494_v37  ;;  %v1492_v19 = vpop.permute.xlu0 %1491 }
 0xa51   : > { %1510 = vst.msk [vmem:[#allocation2 + $0x30] sm:$0xff] %vm1503_vm4, %v1492_v19 }
 0xa53   : > { %v2031_v39 = vpop.permute.xlu1 %2030 }
 0xa54   : > { %2050 = vst.msk [vmem:[#allocation2 + $0x28] sm:$0xff] %vm2044_vm5, %v2031_v39  ;;  %v2029_v40 = vpop.permute.xlu0 %2028 }
 0xa55   : > { %2049 = vst.msk [vmem:[#allocation2 + $0x20] sm:$0xff] %vm2044_vm5, %v2029_v40 }
 0xa57   : > { %v2035_v29 = vpop.permute.xlu1 %2034 }
 0xa58   : > { %2052 = vst.msk [vmem:[#allocation2 + $0x38] sm:$0xff] %vm2044_vm5, %v2035_v29  ;;  %v2033_v41 = vpop.permute.xlu0 %2032 }
 0xa59   : > { %2051 = vst.msk [vmem:[#allocation2 + $0x30] sm:$0xff] %vm2044_vm5, %v2033_v41 }
 0xb07   : > { %v2405_v43 = vpop.f32.mrb[56].mxu0 }
 0xb08   : > { %2561 = vrot.lane.b32.xlu0 %v2405_v43, %s3370_s28  ;;  %v3115_v38 = vpop.f32.mrb[57].mxu0 }
 0xb09   : > { %v2408_v47 = vpop.f32.mrb[58].mxu0 }
 0xb0a   : > { %2563 = vrot.lane.b32.xlu1 %v2408_v47, %s3370_s28  ;;  %v3116_v59 = vpop.f32.mrb[59].mxu0 }
 0xb0f   : > { %v2452_v48 = vpop.f32.mrb[64].mxu1 }
 0xb10   : > { %2565 = vrot.lane.b32.xlu0 %v2452_v48, %s3370_s28  ;;  %v3121_v50 = vpop.f32.mrb[65].mxu1 }
 0xb11   : > { %v2455_v53 = vpop.f32.mrb[66].mxu1 }
 0xb12   : > { %2567 = vrot.lane.b32.xlu1 %v2455_v53, %s3370_s28  ;;  %v3122_v2 = vpop.f32.mrb[67].mxu1 }
 0xb13   : > { %v2499_v56 = vpop.f32.mrb[60].mxu0 }
 0xb14   : > { %v3127_v7 = vpop.f32.mrb[61].mxu0  ;;  %2569 = vrot.lane.b32.xlu0 %v2499_v56, %s3370_s28 }
 0xb15   : > { %v2502_v61 = vpop.f32.mrb[62].mxu0 }
 0xb16   : > { %v3128_v63 = vpop.f32.mrb[63].mxu0  ;;  %2571 = vrot.lane.b32.xlu1 %v2502_v61, %s3370_s28 }
 0xb17   : > { %v2546_v17 = vpop.f32.mrb[68].mxu1 }
 0xb18   : > { %2573 = vrot.lane.b32.xlu0 %v2546_v17, %s3370_s28  ;;  %v3133_v51 = vpop.f32.mrb[69].mxu1 }
 0xb19   : > { %v2549_v1 = vpop.f32.mrb[70].mxu1 }
 0xb1a   : > { %2575 = vrot.lane.b32.xlu1 %v2549_v1, %s3370_s28  ;;  %v3134_v31 = vpop.f32.mrb[71].mxu1 }
 0xb7a   : > { %v2562_v33 = vpop.permute.xlu0 %2561 }
 0xb7b   : > { %2586 = vst.msk [vmem:[#allocation2] sm:$0xff] %vm2585_vm6, %v2562_v33 }
 0xb7c   : > { %v2564_v35 = vpop.permute.xlu1 %2563 }
 0xb7d   : > { %2587 = vst.msk [vmem:[#allocation2 + $0x8] sm:$0xff] %vm2585_vm6, %v2564_v35 }
 0xb82   : > { %v2566_v60 = vpop.permute.xlu0 %2565  ;;  %v2594_v0 = vld [vmem:[#allocation2] sm:$0xff] }
 0xb83   : > { %2588 = vst.msk [vmem:[#allocation2 + $0x10] sm:$0xff] %vm2585_vm6, %v2566_v60 }
 0xb84   : > { %v2568_v62 = vpop.permute.xlu1 %2567  ;;  %v2595_v3 = vld [vmem:[#allocation2 + $0x8] sm:$0xff] }
 0xb85   : > { %2589 = vst.msk [vmem:[#allocation2 + $0x18] sm:$0xff] %vm2585_vm6, %v2568_v62  ;;  %v2602_v5 = vpack.c.bf16 %v2595_v3, %v2594_v0 }
 0xb86   : > { %v2570_v8 = vpop.permute.xlu0 %2569 }
 0xb87   : > { %2590 = vst.msk [vmem:[#allocation2 + $0x20] sm:$0xff] %vm2585_vm6, %v2570_v8  ;;  %3139 = vmatprep.mubr.msk.bf16.mxu0 %vm367_vm0, %v2602_v5 }
 0xb88   : > { %v2572_v10 = vpop.permute.xlu1 %2571 }
 0xb89   : > { %2591 = vst.msk [vmem:[#allocation2 + $0x28] sm:$0xff] %vm2585_vm6, %v2572_v10 }
 0xb8a   : > { %v2574_v12 = vpop.permute.xlu0 %2573  ;;  %v2596_v46 = vld [vmem:[#allocation2 + $0x10] sm:$0xff] }
 0xb8b   : > { %2592 = vst.msk [vmem:[#allocation2 + $0x30] sm:$0xff] %vm2585_vm6, %v2574_v12 }
 0xb8c   : > { %v2576_v45 = vpop.permute.xlu1 %2575  ;;  %v2597_v49 = vld [vmem:[#allocation2 + $0x18] sm:$0xff] }
 0xb8d   : > { %2593 = vst.msk [vmem:[#allocation2 + $0x38] sm:$0xff] %vm2585_vm6, %v2576_v45  ;;  %v2603_v52 = vpack.c.bf16 %v2597_v49, %v2596_v46 }
 0xb8e   : > { %v2598_v54 = vld [vmem:[#allocation2 + $0x20] sm:$0xff] }
 0xb8f   : > { %3140 = vmatmul.mubr.msk.bf16.vlgmr.msra.gmra.mrb[64].mxu0 %vm367_vm0, %v2603_v52 }
 0xb90   : > { %v2599_v55 = vld [vmem:[#allocation2 + $0x28] sm:$0xff] }
 0xb91   : > { %v2604_v57 = vpack.c.bf16 %v2599_v55, %v2598_v54 }
 0xb92   : > { %v2600_v58 = vld [vmem:[#allocation2 + $0x30] sm:$0xff] }
 0xb93   : > { %3143 = vmatprep.mubr.msk.bf16.mxu0 %vm367_vm0, %v2604_v57 }
 0xb94   : > { %v2601_v4 = vld [vmem:[#allocation2 + $0x38] sm:$0xff] }
 0xb95   : > { %v2605_v6 = vpack.c.bf16 %v2601_v4, %v2600_v58 }
 0xb97   : > { %3144 = vmatmul.mubr.msk.bf16.gmra.mrb[68].mxu0 %vm367_vm0, %v2605_v6 }
 0xc62   : > { %v3141_v15 = vpop.f32.mrb[64].mxu0 }
 0xc63   : > { %v2684_v9 = vadd.f32 %v3141_v15, %v2846_v23  ;;  %v2675_v13 = vpop.f32.mrb[65].mxu0 }
 0xc64   : > { %v2676_v16 = vadd.f32 %v2846_v23, %v2675_v13  ;;  %v3142_v18 = vpop.f32.mrb[66].mxu0 }
 0xc65   : > { %2708 = vst.msk [vmem:[%s328_s14 + $0x10] sm:$0xff] %vm367_vm0, %v2684_v9  ;;  %v2687_v20 = vadd.f32 %v3142_v18, %v2846_v23  ;;  %v2678_v21 = vpop.f32.mrb[67].mxu0 }
 0xc66   : > { %2706 = vst.msk [vmem:[%s328_s14] sm:$0xff] %vm367_vm0, %v2676_v16  ;;  %v2679_v22 = vadd.f32 %v2846_v23, %v2678_v21 }
 0xc67   : > { %2709 = vst.msk [vmem:[%s328_s14 + $0x18] sm:$0xff] %vm367_vm0, %v2687_v20 }
 0xc68   : > { %2707 = vst.msk [vmem:[%s328_s14 + $0x8] sm:$0xff] %vm367_vm0, %v2679_v22 }
 0xc6a   : > { %v3145_v24 = vpop.f32.mrb[68].mxu0 }
 0xc6b   : > { %v2700_v25 = vadd.f32 %v3145_v24, %v2846_v23  ;;  %v2691_v26 = vpop.f32.mrb[69].mxu0 }
 0xc6c   : > { %v2692_v27 = vadd.f32 %v2846_v23, %v2691_v26  ;;  %v3146_v28 = vpop.f32.mrb[70].mxu0 }
 0xc6d   : > { %2712 = vst.msk [vmem:[%s328_s14 + $0x30] sm:$0xff] %vm367_vm0, %v2700_v25  ;;  %v2703_v30 = vadd.f32 %v3146_v28, %v2846_v23  ;;  %v2694_v14 = vpop.f32.mrb[71].mxu0 }
 0xc6e   : > { %2710 = vst.msk [vmem:[%s328_s14 + $0x20] sm:$0xff] %vm367_vm0, %v2692_v27  ;;  %v2695_v32 = vadd.f32 %v2846_v23, %v2694_v14 }
 0xc6f   : > { %2713 = vst.msk [vmem:[%s328_s14 + $0x38] sm:$0xff] %vm367_vm0, %v2703_v30 }
 0xc70   : > { %2711 = vst.msk [vmem:[%s328_s14 + $0x28] sm:$0xff] %vm367_vm0, %v2695_v32 }
 0xc71 PF: > { %s17_s26 = sadd.s32 1, %s3353_s26   ;;  %s4033_s24 = smov %s3349_s25 }
 0xc72   : > { %p14_p5 = scmp.ge.s32.totalorder %s17_s26, 4   ;;  %s4034_s25 = smov %s4036_s27 }
 0xc74   :  { %16 = sbr.rel (!%p14_p5) target bundleno = 2 (0x2), region = 81 }

</bundles_post_ra>
